<compile_context>
chip_gen: v7x
topology: tpu7x:2x2x1
jax: 0.10.0
libtpu: 0.0.40
codegen_flags: <defaults>
</compile_context>

<pallas_src>
import jax
import jax.numpy as jnp
from jax import lax
from jax.experimental import pallas as pl
from jax.experimental.pallas import tpu as pltpu
import numpy as np

_INV_SQRT2 = 0.7071067811865476


def _gelu(x):
    # Exact (erf-based) GELU, matching torch.nn.GELU default.
    # TODO(synk): tanh-approx GELU would move work to the EUP slot but changes
    # numerics vs torch (~1e-3); keeping exact erf for parity.
    return 0.5 * x * (1.0 + lax.erf(x * _INV_SQRT2))


def _round_up(n, m):
    return (n + m - 1) // m * m


def conv_mlp_kernel(x_ref, w1_ref, b1_ref, dww_ref, bns_ref, bnb_ref,
                    w2_ref, b2_ref, o_ref, wp_ref):
    # x_ref   : (1, H, W, Cin)  bf16   one image of the batch
    # w1_ref  : (Cin, Ch)       bf16   fc1 weight (1x1 conv as matmul)
    # b1_ref  : (1, Ch)         f32
    # dww_ref : (3, 3, Ch)      f32    depthwise 3x3 weights
    # bns_ref : (1, Ch)         f32    BN folded scale = gamma / sqrt(var+eps)
    # bnb_ref : (1, Ch)         f32    BN folded bias  = beta - mean * scale
    # w2_ref  : (Ch, Cout)      bf16   fc2 weight
    # b2_ref  : (1, Cout)       f32
    # o_ref   : (1, H, W, Cout) f32
    # wp_ref  : (H+2, W+2, Ch)  f32    VMEM scratch (zero-padded activation)
    _, H, W, Cin = x_ref.shape
    Ch = w1_ref.shape[1]

    # ---- fc1: 1x1 conv == channel matmul (bf16 MXU, f32 acc) + bias + GELU --
    x2 = x_ref[0].reshape(H * W, Cin)
    h = jnp.dot(x2, w1_ref[...], preferred_element_type=jnp.float32)
    h = _gelu(h + b1_ref[...]).reshape(H, W, Ch)            # f32

    # ---- depthwise 3x3 conv (padding=1, no bias) ----------------------------
    # Zero only the border rows/cols; the interior is fully overwritten every
    # step.  Doing it per step (instead of under program_id==0) keeps it
    # correct when the batch axis is split across TensorCores.
    wp_ref[0:1, :, :] = jnp.zeros((1, W + 2, Ch), jnp.float32)
    wp_ref[H + 1:H + 2, :, :] = jnp.zeros((1, W + 2, Ch), jnp.float32)
    wp_ref[:, 0:1, :] = jnp.zeros((H + 2, 1, Ch), jnp.float32)
    wp_ref[:, W + 1:W + 2, :] = jnp.zeros((H + 2, 1, Ch), jnp.float32)
    wp_ref[1:H + 1, 1:W + 1, :] = h

    dw = dww_ref[...]                                       # hoisted once
    acc = jnp.zeros((H, W, Ch), jnp.float32)
    for dx in range(3):
        # One column-shifted slab per kernel column (3 reads instead of 9);
        # the row (H) shifts are cheap leading-dim slices of a value.
        col = wp_ref[:, dx:dx + W, :]                       # (H+2, W, Ch)
        acc = acc + (dw[0, dx] * col[0:H]
                     + dw[1, dx] * col[1:H + 1]
                     + dw[2, dx] * col[2:H + 2])

    # ---- BatchNorm2d (inference affine) + GELU ------------------------------
    a = _gelu(acc * bns_ref[...] + bnb_ref[...])

    # ---- fc2: 1x1 conv == channel matmul (bf16 MXU, f32 acc) + bias ---------
    a2 = a.reshape(H * W, Ch).astype(jnp.bfloat16)
    out = jnp.dot(a2, w2_ref[...], preferred_element_type=jnp.float32)
    out = out + b2_ref[...]
    o_ref[0] = out.reshape(H, W, -1).astype(o_ref.dtype)


@jax.jit
def conv_mlp_pallas(x_nchw, params):
    """x_nchw: (B, Cin, H, W) float32. Returns (B, Cout, H, W) float32."""
    w1, b1, dww, bns, bnb, w2, b2 = (params[k] for k in
                                     ("w1", "b1", "dww", "bns", "bnb", "w2", "b2"))
    B, Cin, H, W = x_nchw.shape
    Ch = w1.shape[1]
    Cout = w2.shape[1]

    LANE = 128
    Cin_p, Ch_p, Cout_p = (_round_up(c, LANE) for c in (Cin, Ch, Cout))

    # NCHW -> NHWC, pad channels to lane multiples, cast MXU operands to bf16.
    # TODO(synk): keep the surrounding model NHWC end-to-end so this layout
    # change (two full HBM round trips of the activation) leaves the hot path.
    x = jnp.transpose(x_nchw, (0, 2, 3, 1))
    x = jnp.pad(x, ((0, 0), (0, 0), (0, 0), (0, Cin_p - Cin))).astype(jnp.bfloat16)

    w1p = jnp.pad(w1, ((0, Cin_p - Cin), (0, Ch_p - Ch))).astype(jnp.bfloat16)
    b1p = jnp.pad(b1, ((0, 0), (0, Ch_p - Ch)))
    dwwp = jnp.pad(dww, ((0, 0), (0, 0), (0, Ch_p - Ch)))
    bnsp = jnp.pad(bns, ((0, 0), (0, Ch_p - Ch)))
    bnbp = jnp.pad(bnb, ((0, 0), (0, Ch_p - Ch)))
    w2p = jnp.pad(w2, ((0, Ch_p - Ch), (0, Cout_p - Cout))).astype(jnp.bfloat16)
    b2p = jnp.pad(b2, ((0, 0), (0, Cout_p - Cout)))

    # Scoped-VMEM budget sized to the real tile footprint (defaults: 16/32 MiB).
    tile_bytes = (
        2 * H * W * Cin_p * 2                      # x block, double-buffered, bf16
        + 2 * H * W * Cout_p * 4                   # out block, double-buffered, f32
        + 2 * (Cin_p * Ch_p + Ch_p * Cout_p) * 2   # w1/w2 blocks, bf16
        + 2 * (12 * Ch_p + Cout_p) * 4             # b1/dw/bn/b2 blocks, f32
        + (H + 2) * (W + 2) * Ch_p * 4             # padded-activation scratch
        + 6 * H * W * Ch_p * 4                     # live intermediates headroom
    )
    vmem_limit = int(min(max(2 * tile_bytes, 8 * 1024 * 1024), 64 * 1024 * 1024))

    full = lambda arr: pl.BlockSpec(arr.shape, lambda b: (0,) * arr.ndim)

    # TODO(synk): for very large H*W (v7x: 64 MiB VMEM) this whole-image-per-
    # step tiling should become row blocks with a 1-row halo (manual DMA).
    out_nhwc = pl.pallas_call(
        conv_mlp_kernel,
        out_shape=jax.ShapeDtypeStruct((B, H, W, Cout_p), jnp.float32),
        grid=(B,),
        in_specs=[
            pl.BlockSpec((1, H, W, Cin_p), lambda b: (b, 0, 0, 0)),
            full(w1p), full(b1p), full(dwwp), full(bnsp), full(bnbp),
            full(w2p), full(b2p),
        ],
        out_specs=pl.BlockSpec((1, H, W, Cout_p), lambda b: (b, 0, 0, 0)),
        scratch_shapes=[pltpu.VMEM((H + 2, W + 2, Ch_p), jnp.float32)],
        compiler_params=pltpu.CompilerParams(
            dimension_semantics=("parallel",),
            vmem_limit_bytes=vmem_limit),
    )(x, w1p, b1p, dwwp, bnsp, bnbp, w2p, b2p)

    out_nhwc = out_nhwc[:, :, :, :Cout]
    return jnp.transpose(out_nhwc, (0, 3, 1, 2))  # -> NCHW


def conv_mlp_ref(x_nchw, params):
    """Pure-JAX f32 reference (same NHWC math) for validation."""
    w1, b1, dww, bns, bnb, w2, b2 = (params[k] for k in
                                     ("w1", "b1", "dww", "bns", "bnb", "w2", "b2"))
    x = jnp.transpose(x_nchw, (0, 2, 3, 1))
    h = jnp.einsum("bhwc,cd->bhwd", x, w1) + b1[0]
    h = _gelu(h)
    hp = jnp.pad(h, ((0, 0), (1, 1), (1, 1), (0, 0)))
    H, W = x.shape[1], x.shape[2]
    acc = jnp.zeros_like(h)
    for dh in range(3):
        for dw in range(3):
            acc = acc + hp[:, dh:dh + H, dw:dw + W, :] * dww[dh, dw, :]
    acc = _gelu(acc * bns[0] + bnb[0])
    out = jnp.einsum("bhwc,cd->bhwd", acc, w2) + b2[0]
    return jnp.transpose(out, (0, 3, 1, 2))


def init_params(key, in_features, hidden_features, out_features):
    ks = jax.random.split(key, 8)
    f32 = jnp.float32
    # fc1: torch weight (Ch, Cin, 1, 1) -> stored as (Cin, Ch)
    w1 = 0.1 * jax.random.normal(ks[0], (in_features, hidden_features), f32)
    b1 = 0.05 * jax.random.normal(ks[1], (1, hidden_features), f32)
    # dw_conv: torch weight (Ch, 1, 3, 3) -> stored as (3, 3, Ch)
    dww = 0.1 * jax.random.normal(ks[2], (3, 3, hidden_features), f32)
    # BatchNorm2d folded to inference-mode affine (running stats synthetic).
    # TODO(synk): training-mode BN (batch statistics) not implemented; eval-mode affine only.
    gamma = 1.0 + 0.1 * jax.random.normal(ks[3], (hidden_features,), f32)
    beta = 0.05 * jax.random.normal(ks[4], (hidden_features,), f32)
    run_mean = 0.01 * jax.random.normal(ks[5], (hidden_features,), f32)
    run_var = 1.0 + 0.1 * jnp.abs(jax.random.normal(ks[6], (hidden_features,), f32))
    eps = 1e-5
    bns = (gamma / jnp.sqrt(run_var + eps)).reshape(1, hidden_features)
    bnb = (beta - run_mean * bns[0]).reshape(1, hidden_features)
    # fc2: torch weight (Cout, Ch, 1, 1) -> stored as (Ch, Cout)
    w2 = 0.1 * jax.random.normal(ks[7], (hidden_features, out_features), f32)
    b2 = 0.05 * jnp.ones((1, out_features), f32)
    return dict(w1=w1, b1=b1, dww=dww, bns=bns, bnb=bnb, w2=w2, b2=b2)


if __name__ == "__main__":
    B, Cin, H, W = 2, 4, 16, 16
    hidden, Cout = 8, 4

    key = jax.random.PRNGKey(0)
    kx, kp = jax.random.split(key)
    x = jax.random.normal(kx, (B, Cin, H, W), jnp.float32)
    params = init_params(kp, Cin, hidden, Cout)

    out = jax.block_until_ready(conv_mlp_pallas(x, params))
    ref = jax.block_until_ready(conv_mlp_ref(x, params))

    assert out.shape == (B, Cout, H, W)
    # bf16 MXU operands (per perf review) -> compare against the f32 reference
    # with a bf16-appropriate tolerance.
    np.testing.assert_allclose(np.asarray(out), np.asarray(ref),
                               rtol=2e-2, atol=2e-2)
    print("KERNEL_OK")
</pallas_src>

<mosaic_0001>
module attributes {stable_mosaic.version = 11 : i64} {
  func.func @conv_mlp_kernel(%arg0: i32, %arg1: memref<1x16x16x128xbf16, #tpu.memory_space<vmem>>, %arg2: memref<128x128xbf16, #tpu.memory_space<vmem>>, %arg3: memref<1x128xf32, #tpu.memory_space<vmem>>, %arg4: memref<3x3x128xf32, #tpu.memory_space<vmem>>, %arg5: memref<1x128xf32, #tpu.memory_space<vmem>>, %arg6: memref<1x128xf32, #tpu.memory_space<vmem>>, %arg7: memref<128x128xbf16, #tpu.memory_space<vmem>>, %arg8: memref<1x128xf32, #tpu.memory_space<vmem>>, %arg9: memref<1x16x16x128xf32, #tpu.memory_space<vmem>>, %arg10: memref<18x18x128xf32, #tpu.memory_space<vmem>>) attributes {dimension_semantics = [#tpu.dimension_semantics<parallel>], iteration_bounds = array<i64: 2>, scalar_prefetch = 0 : i64, scratch_operands = 1 : i64, tpu.core_type = #tpu.core_type<tc>, window_params = [{transform_indices = @transform_0, window_bounds = array<i64: 1, 16, 16, 128>}, {pipeline_mode = #tpu.pipeline_mode<synchronous>, transform_indices = @transform_1, window_bounds = array<i64: 128, 128>}, {pipeline_mode = #tpu.pipeline_mode<synchronous>, transform_indices = @transform_2, window_bounds = array<i64: 1, 128>}, {pipeline_mode = #tpu.pipeline_mode<synchronous>, transform_indices = @transform_3, window_bounds = array<i64: 3, 3, 128>}, {pipeline_mode = #tpu.pipeline_mode<synchronous>, transform_indices = @transform_4, window_bounds = array<i64: 1, 128>}, {pipeline_mode = #tpu.pipeline_mode<synchronous>, transform_indices = @transform_5, window_bounds = array<i64: 1, 128>}, {pipeline_mode = #tpu.pipeline_mode<synchronous>, transform_indices = @transform_6, window_bounds = array<i64: 128, 128>}, {pipeline_mode = #tpu.pipeline_mode<synchronous>, transform_indices = @transform_7, window_bounds = array<i64: 1, 128>}, {transform_indices = @transform_8, window_bounds = array<i64: 1, 16, 16, 128>}]} {
    %c0 = arith.constant 0 : index
    %c0_0 = arith.constant 0 : index
    %c0_1 = arith.constant 0 : index
    %c0_2 = arith.constant 0 : index
    %0 = vector.load %arg1[%c0, %c0_0, %c0_1, %c0_2] : memref<1x16x16x128xbf16, #tpu.memory_space<vmem>>, vector<1x16x16x128xbf16>
    %1 = vector.shape_cast %0 : vector<1x16x16x128xbf16> to vector<16x16x128xbf16>
    %2 = vector.shape_cast %1 : vector<16x16x128xbf16> to vector<256x128xbf16>
    %c0_3 = arith.constant 0 : index
    %c0_4 = arith.constant 0 : index
    %3 = vector.load %arg2[%c0_3, %c0_4] : memref<128x128xbf16, #tpu.memory_space<vmem>>, vector<128x128xbf16>
    %cst = arith.constant dense<0.000000e+00> : vector<256x128xf32>
    %4 = tpu.matmul %2, %3, %cst {dimension_numbers = #tpu.dot_dimension_numbers<[1], [0], [0], [1], [0, 0, 1, 1], [], []>} : vector<256x128xbf16>, vector<128x128xbf16>, vector<256x128xf32> -> vector<256x128xf32>
    %c0_5 = arith.constant 0 : index
    %c0_6 = arith.constant 0 : index
    %5 = vector.load %arg3[%c0_5, %c0_6] : memref<1x128xf32, #tpu.memory_space<vmem>>, vector<1x128xf32>
    %6 = vector.broadcast %5 : vector<1x128xf32> to vector<256x128xf32>
    %7 = arith.addf %4, %6 : vector<256x128xf32>
    %cst_7 = arith.constant 5.000000e-01 : f32
    %8 = vector.broadcast %cst_7 : f32 to vector<256x128xf32>
    %9 = arith.mulf %8, %7 : vector<256x128xf32>
    %cst_8 = arith.constant 0.707106769 : f32
    %10 = vector.broadcast %cst_8 : f32 to vector<256x128xf32>
    %11 = arith.mulf %7, %10 : vector<256x128xf32>
    %12 = math.erf %11 : vector<256x128xf32>
    %cst_9 = arith.constant 1.000000e+00 : f32
    %13 = vector.broadcast %cst_9 : f32 to vector<256x128xf32>
    %14 = arith.addf %13, %12 : vector<256x128xf32>
    %15 = arith.mulf %9, %14 : vector<256x128xf32>
    %16 = vector.shape_cast %15 : vector<256x128xf32> to vector<16x16x128xf32>
    %cst_10 = arith.constant 0.000000e+00 : f32
    %17 = vector.broadcast %cst_10 : f32 to vector<1x18x128xf32>
    %c0_11 = arith.constant 0 : index
    %c0_12 = arith.constant 0 : index
    %c0_13 = arith.constant 0 : index
    %18 = vector.load %arg10[%c0_11, %c0_12, %c0_13] : memref<18x18x128xf32, #tpu.memory_space<vmem>>, vector<1x18x128xf32>
    tpu.vector_store %arg10[%c0_11, %c0_12, %c0_13], %17 {strides = array<i32>} : memref<18x18x128xf32, #tpu.memory_space<vmem>>, vector<1x18x128xf32>,
    %cst_14 = arith.constant 0.000000e+00 : f32
    %19 = vector.broadcast %cst_14 : f32 to vector<1x18x128xf32>
    %c17 = arith.constant 17 : index
    %c0_15 = arith.constant 0 : index
    %c0_16 = arith.constant 0 : index
    %20 = vector.load %arg10[%c17, %c0_15, %c0_16] : memref<18x18x128xf32, #tpu.memory_space<vmem>>, vector<1x18x128xf32>
    tpu.vector_store %arg10[%c17, %c0_15, %c0_16], %19 {strides = array<i32>} : memref<18x18x128xf32, #tpu.memory_space<vmem>>, vector<1x18x128xf32>,
    %cst_17 = arith.constant 0.000000e+00 : f32
    %21 = vector.broadcast %cst_17 : f32 to vector<18x1x128xf32>
    %c0_18 = arith.constant 0 : index
    %c0_19 = arith.constant 0 : index
    %c0_20 = arith.constant 0 : index
    %22 = vector.load %arg10[%c0_18, %c0_19, %c0_20] : memref<18x18x128xf32, #tpu.memory_space<vmem>>, vector<18x1x128xf32>
    tpu.vector_store %arg10[%c0_18, %c0_19, %c0_20], %21 {strides = array<i32>} : memref<18x18x128xf32, #tpu.memory_space<vmem>>, vector<18x1x128xf32>,
    %cst_21 = arith.constant 0.000000e+00 : f32
    %23 = vector.broadcast %cst_21 : f32 to vector<18x1x128xf32>
    %c0_22 = arith.constant 0 : index
    %c17_23 = arith.constant 17 : index
    %c0_24 = arith.constant 0 : index
    %24 = vector.load %arg10[%c0_22, %c17_23, %c0_24] : memref<18x18x128xf32, #tpu.memory_space<vmem>>, vector<18x1x128xf32>
    tpu.vector_store %arg10[%c0_22, %c17_23, %c0_24], %23 {strides = array<i32>} : memref<18x18x128xf32, #tpu.memory_space<vmem>>, vector<18x1x128xf32>,
    %c1 = arith.constant 1 : index
    %c1_25 = arith.constant 1 : index
    %c0_26 = arith.constant 0 : index
    %25 = vector.load %arg10[%c1, %c1_25, %c0_26] : memref<18x18x128xf32, #tpu.memory_space<vmem>>, vector<16x16x128xf32>
    tpu.vector_store %arg10[%c1, %c1_25, %c0_26], %16 {strides = array<i32>} : memref<18x18x128xf32, #tpu.memory_space<vmem>>, vector<16x16x128xf32>,
    %c0_27 = arith.constant 0 : index
    %c0_28 = arith.constant 0 : index
    %c0_29 = arith.constant 0 : index
    %26 = vector.load %arg4[%c0_27, %c0_28, %c0_29] : memref<3x3x128xf32, #tpu.memory_space<vmem>>, vector<3x3x128xf32>
    %cst_30 = arith.constant 0.000000e+00 : f32
    %27 = vector.broadcast %cst_30 : f32 to vector<16x16x128xf32>
    %c0_31 = arith.constant 0 : index
    %c0_32 = arith.constant 0 : index
    %c0_33 = arith.constant 0 : index
    %28 = vector.load %arg10[%c0_31, %c0_32, %c0_33] : memref<18x18x128xf32, #tpu.memory_space<vmem>>, vector<18x16x128xf32>
    %29 = vector.extract_strided_slice %26 {offsets = [0, 0, 0], sizes = [1, 1, 128], strides = [1, 1, 1]} : vector<3x3x128xf32> to vector<1x1x128xf32>
    %30 = vector.shape_cast %29 : vector<1x1x128xf32> to vector<128xf32>
    %31 = vector.extract_strided_slice %28 {offsets = [0, 0, 0], sizes = [16, 16, 128], strides = [1, 1, 1]} : vector<18x16x128xf32> to vector<16x16x128xf32>
    %32 = vector.shape_cast %30 : vector<128xf32> to vector<1x1x128xf32>
    %33 = vector.broadcast %32 : vector<1x1x128xf32> to vector<16x16x128xf32>
    %34 = arith.mulf %33, %31 : vector<16x16x128xf32>
    %35 = vector.extract_strided_slice %26 {offsets = [1, 0, 0], sizes = [1, 1, 128], strides = [1, 1, 1]} : vector<3x3x128xf32> to vector<1x1x128xf32>
    %36 = vector.shape_cast %35 : vector<1x1x128xf32> to vector<128xf32>
    %37 = vector.extract_strided_slice %28 {offsets = [1, 0, 0], sizes = [16, 16, 128], strides = [1, 1, 1]} : vector<18x16x128xf32> to vector<16x16x128xf32>
    %38 = vector.shape_cast %36 : vector<128xf32> to vector<1x1x128xf32>
    %39 = vector.broadcast %38 : vector<1x1x128xf32> to vector<16x16x128xf32>
    %40 = arith.mulf %39, %37 : vector<16x16x128xf32>
    %41 = arith.addf %34, %40 : vector<16x16x128xf32>
    %42 = vector.extract_strided_slice %26 {offsets = [2, 0, 0], sizes = [1, 1, 128], strides = [1, 1, 1]} : vector<3x3x128xf32> to vector<1x1x128xf32>
    %43 = vector.shape_cast %42 : vector<1x1x128xf32> to vector<128xf32>
    %44 = vector.extract_strided_slice %28 {offsets = [2, 0, 0], sizes = [16, 16, 128], strides = [1, 1, 1]} : vector<18x16x128xf32> to vector<16x16x128xf32>
    %45 = vector.shape_cast %43 : vector<128xf32> to vector<1x1x128xf32>
    %46 = vector.broadcast %45 : vector<1x1x128xf32> to vector<16x16x128xf32>
    %47 = arith.mulf %46, %44 : vector<16x16x128xf32>
    %48 = arith.addf %41, %47 : vector<16x16x128xf32>
    %49 = arith.addf %27, %48 : vector<16x16x128xf32>
    %c0_34 = arith.constant 0 : index
    %c1_35 = arith.constant 1 : index
    %c0_36 = arith.constant 0 : index
    %50 = vector.load %arg10[%c0_34, %c1_35, %c0_36] : memref<18x18x128xf32, #tpu.memory_space<vmem>>, vector<18x16x128xf32>
    %51 = vector.extract_strided_slice %26 {offsets = [0, 1, 0], sizes = [1, 1, 128], strides = [1, 1, 1]} : vector<3x3x128xf32> to vector<1x1x128xf32>
    %52 = vector.shape_cast %51 : vector<1x1x128xf32> to vector<128xf32>
    %53 = vector.extract_strided_slice %50 {offsets = [0, 0, 0], sizes = [16, 16, 128], strides = [1, 1, 1]} : vector<18x16x128xf32> to vector<16x16x128xf32>
    %54 = vector.shape_cast %52 : vector<128xf32> to vector<1x1x128xf32>
    %55 = vector.broadcast %54 : vector<1x1x128xf32> to vector<16x16x128xf32>
    %56 = arith.mulf %55, %53 : vector<16x16x128xf32>
    %57 = vector.extract_strided_slice %26 {offsets = [1, 1, 0], sizes = [1, 1, 128], strides = [1, 1, 1]} : vector<3x3x128xf32> to vector<1x1x128xf32>
    %58 = vector.shape_cast %57 : vector<1x1x128xf32> to vector<128xf32>
    %59 = vector.extract_strided_slice %50 {offsets = [1, 0, 0], sizes = [16, 16, 128], strides = [1, 1, 1]} : vector<18x16x128xf32> to vector<16x16x128xf32>
    %60 = vector.shape_cast %58 : vector<128xf32> to vector<1x1x128xf32>
    %61 = vector.broadcast %60 : vector<1x1x128xf32> to vector<16x16x128xf32>
    %62 = arith.mulf %61, %59 : vector<16x16x128xf32>
    %63 = arith.addf %56, %62 : vector<16x16x128xf32>
    %64 = vector.extract_strided_slice %26 {offsets = [2, 1, 0], sizes = [1, 1, 128], strides = [1, 1, 1]} : vector<3x3x128xf32> to vector<1x1x128xf32>
    %65 = vector.shape_cast %64 : vector<1x1x128xf32> to vector<128xf32>
    %66 = vector.extract_strided_slice %50 {offsets = [2, 0, 0], sizes = [16, 16, 128], strides = [1, 1, 1]} : vector<18x16x128xf32> to vector<16x16x128xf32>
    %67 = vector.shape_cast %65 : vector<128xf32> to vector<1x1x128xf32>
    %68 = vector.broadcast %67 : vector<1x1x128xf32> to vector<16x16x128xf32>
    %69 = arith.mulf %68, %66 : vector<16x16x128xf32>
    %70 = arith.addf %63, %69 : vector<16x16x128xf32>
    %71 = arith.addf %49, %70 : vector<16x16x128xf32>
    %c0_37 = arith.constant 0 : index
    %c2 = arith.constant 2 : index
    %c0_38 = arith.constant 0 : index
    %72 = vector.load %arg10[%c0_37, %c2, %c0_38] : memref<18x18x128xf32, #tpu.memory_space<vmem>>, vector<18x16x128xf32>
    %73 = vector.extract_strided_slice %26 {offsets = [0, 2, 0], sizes = [1, 1, 128], strides = [1, 1, 1]} : vector<3x3x128xf32> to vector<1x1x128xf32>
    %74 = vector.shape_cast %73 : vector<1x1x128xf32> to vector<128xf32>
    %75 = vector.extract_strided_slice %72 {offsets = [0, 0, 0], sizes = [16, 16, 128], strides = [1, 1, 1]} : vector<18x16x128xf32> to vector<16x16x128xf32>
    %76 = vector.shape_cast %74 : vector<128xf32> to vector<1x1x128xf32>
    %77 = vector.broadcast %76 : vector<1x1x128xf32> to vector<16x16x128xf32>
    %78 = arith.mulf %77, %75 : vector<16x16x128xf32>
    %79 = vector.extract_strided_slice %26 {offsets = [1, 2, 0], sizes = [1, 1, 128], strides = [1, 1, 1]} : vector<3x3x128xf32> to vector<1x1x128xf32>
    %80 = vector.shape_cast %79 : vector<1x1x128xf32> to vector<128xf32>
    %81 = vector.extract_strided_slice %72 {offsets = [1, 0, 0], sizes = [16, 16, 128], strides = [1, 1, 1]} : vector<18x16x128xf32> to vector<16x16x128xf32>
    %82 = vector.shape_cast %80 : vector<128xf32> to vector<1x1x128xf32>
    %83 = vector.broadcast %82 : vector<1x1x128xf32> to vector<16x16x128xf32>
    %84 = arith.mulf %83, %81 : vector<16x16x128xf32>
    %85 = arith.addf %78, %84 : vector<16x16x128xf32>
    %86 = vector.extract_strided_slice %26 {offsets = [2, 2, 0], sizes = [1, 1, 128], strides = [1, 1, 1]} : vector<3x3x128xf32> to vector<1x1x128xf32>
    %87 = vector.shape_cast %86 : vector<1x1x128xf32> to vector<128xf32>
    %88 = vector.extract_strided_slice %72 {offsets = [2, 0, 0], sizes = [16, 16, 128], strides = [1, 1, 1]} : vector<18x16x128xf32> to vector<16x16x128xf32>
    %89 = vector.shape_cast %87 : vector<128xf32> to vector<1x1x128xf32>
    %90 = vector.broadcast %89 : vector<1x1x128xf32> to vector<16x16x128xf32>
    %91 = arith.mulf %90, %88 : vector<16x16x128xf32>
    %92 = arith.addf %85, %91 : vector<16x16x128xf32>
    %93 = arith.addf %71, %92 : vector<16x16x128xf32>
    %c0_39 = arith.constant 0 : index
    %c0_40 = arith.constant 0 : index
    %94 = vector.load %arg5[%c0_39, %c0_40] : memref<1x128xf32, #tpu.memory_space<vmem>>, vector<1x128xf32>
    %95 = vector.shape_cast %94 : vector<1x128xf32> to vector<1x1x128xf32>
    %96 = vector.broadcast %95 : vector<1x1x128xf32> to vector<16x16x128xf32>
    %97 = arith.mulf %93, %96 : vector<16x16x128xf32>
    %c0_41 = arith.constant 0 : index
    %c0_42 = arith.constant 0 : index
    %98 = vector.load %arg6[%c0_41, %c0_42] : memref<1x128xf32, #tpu.memory_space<vmem>>, vector<1x128xf32>
    %99 = vector.shape_cast %98 : vector<1x128xf32> to vector<1x1x128xf32>
    %100 = vector.broadcast %99 : vector<1x1x128xf32> to vector<16x16x128xf32>
    %101 = arith.addf %97, %100 : vector<16x16x128xf32>
    %cst_43 = arith.constant 5.000000e-01 : f32
    %102 = vector.broadcast %cst_43 : f32 to vector<16x16x128xf32>
    %103 = arith.mulf %102, %101 : vector<16x16x128xf32>
    %cst_44 = arith.constant 0.707106769 : f32
    %104 = vector.broadcast %cst_44 : f32 to vector<16x16x128xf32>
    %105 = arith.mulf %101, %104 : vector<16x16x128xf32>
    %106 = math.erf %105 : vector<16x16x128xf32>
    %cst_45 = arith.constant 1.000000e+00 : f32
    %107 = vector.broadcast %cst_45 : f32 to vector<16x16x128xf32>
    %108 = arith.addf %107, %106 : vector<16x16x128xf32>
    %109 = arith.mulf %103, %108 : vector<16x16x128xf32>
    %110 = vector.shape_cast %109 : vector<16x16x128xf32> to vector<256x128xf32>
    %111 = arith.truncf %110 : vector<256x128xf32> to vector<256x128xbf16>
    %c0_46 = arith.constant 0 : index
    %c0_47 = arith.constant 0 : index
    %112 = vector.load %arg7[%c0_46, %c0_47] : memref<128x128xbf16, #tpu.memory_space<vmem>>, vector<128x128xbf16>
    %cst_48 = arith.constant dense<0.000000e+00> : vector<256x128xf32>
    %113 = tpu.matmul %111, %112, %cst_48 {dimension_numbers = #tpu.dot_dimension_numbers<[1], [0], [0], [1], [0, 0, 1, 1], [], []>} : vector<256x128xbf16>, vector<128x128xbf16>, vector<256x128xf32> -> vector<256x128xf32>
    %c0_49 = arith.constant 0 : index
    %c0_50 = arith.constant 0 : index
    %114 = vector.load %arg8[%c0_49, %c0_50] : memref<1x128xf32, #tpu.memory_space<vmem>>, vector<1x128xf32>
    %115 = vector.broadcast %114 : vector<1x128xf32> to vector<256x128xf32>
    %116 = arith.addf %113, %115 : vector<256x128xf32>
    %117 = vector.shape_cast %116 : vector<256x128xf32> to vector<16x16x128xf32>
    %c0_51 = arith.constant 0 : index
    %c0_52 = arith.constant 0 : index
    %c0_53 = arith.constant 0 : index
    %c0_54 = arith.constant 0 : index
    %118 = vector.load %arg9[%c0_51, %c0_52, %c0_53, %c0_54] : memref<1x16x16x128xf32, #tpu.memory_space<vmem>>, vector<1x16x16x128xf32>
    %119 = vector.shape_cast %118 : vector<1x16x16x128xf32> to vector<16x16x128xf32>
    %120 = vector.shape_cast %117 : vector<16x16x128xf32> to vector<1x16x16x128xf32>
    tpu.vector_store %arg9[%c0_51, %c0_52, %c0_53, %c0_54], %120 {strides = array<i32>} : memref<1x16x16x128xf32, #tpu.memory_space<vmem>>, vector<1x16x16x128xf32>,
    return
  }
  func.func @transform_0(%arg0: i32) -> (i32, i32, i32, i32) {
    %c0_i32 = arith.constant 0 : i32
    %c0_i32_0 = arith.constant 0 : i32
    %c0_i32_1 = arith.constant 0 : i32
    %c0_i32_2 = arith.constant 0 : i32
    return %arg0, %c0_i32, %c0_i32_0, %c0_i32_1 : i32, i32, i32, i32
  }
  func.func @transform_1(%arg0: i32) -> (i32, i32) {
    %c0_i32 = arith.constant 0 : i32
    %c0_i32_0 = arith.constant 0 : i32
    %c0_i32_1 = arith.constant 0 : i32
    return %c0_i32, %c0_i32_0 : i32, i32
  }
  func.func @transform_2(%arg0: i32) -> (i32, i32) {
    %c0_i32 = arith.constant 0 : i32
    %c0_i32_0 = arith.constant 0 : i32
    %c0_i32_1 = arith.constant 0 : i32
    return %c0_i32, %c0_i32_0 : i32, i32
  }
  func.func @transform_3(%arg0: i32) -> (i32, i32, i32) {
    %c0_i32 = arith.constant 0 : i32
    %c0_i32_0 = arith.constant 0 : i32
    %c0_i32_1 = arith.constant 0 : i32
    %c0_i32_2 = arith.constant 0 : i32
    return %c0_i32, %c0_i32_0, %c0_i32_1 : i32, i32, i32
  }
  func.func @transform_4(%arg0: i32) -> (i32, i32) {
    %c0_i32 = arith.constant 0 : i32
    %c0_i32_0 = arith.constant 0 : i32
    %c0_i32_1 = arith.constant 0 : i32
    return %c0_i32, %c0_i32_0 : i32, i32
  }
  func.func @transform_5(%arg0: i32) -> (i32, i32) {
    %c0_i32 = arith.constant 0 : i32
    %c0_i32_0 = arith.constant 0 : i32
    %c0_i32_1 = arith.constant 0 : i32
    return %c0_i32, %c0_i32_0 : i32, i32
  }
  func.func @transform_6(%arg0: i32) -> (i32, i32) {
    %c0_i32 = arith.constant 0 : i32
    %c0_i32_0 = arith.constant 0 : i32
    %c0_i32_1 = arith.constant 0 : i32
    return %c0_i32, %c0_i32_0 : i32, i32
  }
  func.func @transform_7(%arg0: i32) -> (i32, i32) {
    %c0_i32 = arith.constant 0 : i32
    %c0_i32_0 = arith.constant 0 : i32
    %c0_i32_1 = arith.constant 0 : i32
    return %c0_i32, %c0_i32_0 : i32, i32
  }
  func.func @transform_8(%arg0: i32) -> (i32, i32, i32, i32) {
    %c0_i32 = arith.constant 0 : i32
    %c0_i32_0 = arith.constant 0 : i32
    %c0_i32_1 = arith.constant 0 : i32
    %c0_i32_2 = arith.constant 0 : i32
    return %arg0, %c0_i32, %c0_i32_0, %c0_i32_1 : i32, i32, i32, i32
  }
}

</mosaic_0001>

<bundles_post_ra>
// kernel: conv_mlp_pallas.1
= control target key start
LH: loop header
LB: loop body
LE: loop exit
PB: predicated region body
PF: predicated region fallthrough
CT: control target
= control target key end

     0   :  { %s2618_s27 = smov 0   ;;  %s3843_s0 = inlined_call_operand.vmem [shape: bf16[2,16,16,128], index: 0, kind: input, shape index: {}]   ;;  %s3844_s1 = inlined_call_operand.vmem [shape: bf16[128,128], index: 1, kind: input, shape index: {}]   ;;  %s3845_s2 = inlined_call_operand.vmem [shape: f32[1,128], index: 2, kind: input, shape index: {}]   ;;  %s3846_s3 = inlined_call_operand.vmem [shape: f32[3,3,128], index: 3, kind: input, shape index: {}]   ;;  %s3847_s4 = inlined_call_operand.vmem [shape: f32[1,128], index: 4, kind: input, shape index: {}]   ;;  %s3848_s5 = inlined_call_operand.vmem [shape: f32[1,128], index: 5, kind: input, shape index: {}]   ;;  %s3849_s6 = inlined_call_operand.vmem [shape: bf16[128,128], index: 6, kind: input, shape index: {}]   ;;  %s3850_s7 = inlined_call_operand.vmem [shape: f32[1,128], index: 7, kind: input, shape index: {}]   ;;  %s3851_s8 = inlined_call_operand.vmem [shape: f32[2,16,16,128], index: 8, kind: output, shape index: {}]  }
   0x1 LB: > { %s2199_s28 = sadd.s32 4294967295, %s2570_s27   ;;  %p2203_p0 = scmp.ge.s32.totalorder %s2570_s27, 1  ;;  %s2570_s27 = sphi %s2618_s27, %s18_s27  }
   0x2   : > { %p262_p1 = scmp.lt.s32.totalorder %s2570_s27, 3 }
   0x4   : > { %p263_p2 = pnand %p2203_p0, %p262_p1 }
   0x6   : > { %266 = sbr.rel (%p263_p2) target bundleno = 748 (0x2ec), region = 52 }
   0xd   : > { %v2401_v0 = vld [vmem:[%s3844_s1] sm:$0xff]   ;;  %p296_p3 = scmp.lt.s32.totalorder %s2199_s28, 1  ;;  %v2402_v1 = vld [vmem:[%s3844_s1 + $0x8] sm:$0xff]   ;;  %v2403_v2 = vld [vmem:[%s3844_s1 + $0x10] sm:$0xff]   ;;  %v2572_v24 = vmov 0.0   ;;  %v942_v33 = vlaneseq }
   0xe   : > { %2296 = vmatprep.subr.bf16.mxu0 %v2401_v0  ;;  %v2404_v3 = vld [vmem:[%s3844_s1 + $0x18] sm:$0xff]   ;;  %v2405_v5 = vld [vmem:[%s3844_s1 + $0x20] sm:$0xff]   ;;  %v2406_v6 = vld [vmem:[%s3844_s1 + $0x28] sm:$0xff]   ;;  %827 = vst [vmem:[#allocation2] sm:$0xff] %v2572_v24 }
   0xf   : > { %s3869_s28 = smov (!%p296_p3, %s2199_s28), 1  ;;  %2297 = vmatpush3.bf16.msra.mxu0 %v2401_v0  ;;  %v2407_v7 = vld [vmem:[%s3844_s1 + $0x30] sm:$0xff]   ;;  %v2408_v8 = vld [vmem:[%s3844_s1 + $0x38] sm:$0xff]   ;;  %828 = vst [vmem:[#allocation2 + $0x8] sm:$0xff] %v2572_v24  ;;  %829 = vst [vmem:[#allocation2 + $0x10] sm:$0x3] %v2572_v24 }
  0x10   : > { %2298 = vmatprep.subr.bf16.mxu0 %v2402_v1  ;;  %s2246_s13 = sshll.u32 %s3869_s28, 7  ;;  %835 = vst [vmem:[#allocation2 + $0x18] sm:$0x1] %v2572_v24  ;;  %836 = vst [vmem:[#allocation2 + $0x30] sm:$0x1] %v2572_v24  ;;  %v2425_v25 = vld [vmem:[%s3849_s6] sm:$0xff]  }
  0x11   : > { %s2641_s16 = scalar_lea.vmem %s3843_s0, %s2246_s13  ;;  %853 = vst [vmem:[#allocation2 + $0x29] sm:$0x1] %v2572_v24  ;;  %854 = vst [vmem:[#allocation2 + $0x41] sm:$0x1] %v2572_v24  ;;  %2344 = vmatprep.subr.bf16.mxu1 %v2425_v25  ;;  %v2426_v26 = vld [vmem:[%s3849_s6 + $0x8] sm:$0xff]   ;;  %v2427_v27 = vld [vmem:[%s3849_s6 + $0x10] sm:$0xff]  }
  0x12   : > { %v2409_v4 = vld [vmem:[%s2641_s16] sm:$0xff]   ;;  %v2410_v9 = vld [vmem:[%s2641_s16 + $0x8] sm:$0xff]   ;;  %v2411_v10 = vld [vmem:[%s2641_s16 + $0x10] sm:$0xff]   ;;  %831 = vst [vmem:[#allocation2 + $0x198] sm:$0xff] %v2572_v24  ;;  %2345 = vmatpush3.bf16.msra.mxu1 %v2425_v25  ;;  %v943_v36 = vshrl.u32 %v942_v33, 7  ;;  %s2247_s19 = sshll.u32 %s3869_s28, 8 }
  0x13   : > { %2299 = vmatpush3.bf16.msra.mxu0 %v2402_v1  ;;  %2312 = vmatprep.mubr.bf16.mxu0 %v2409_v4  ;;  %v2412_v11 = vld [vmem:[%s2641_s16 + $0x18] sm:$0xff]   ;;  %v2413_v12 = vld [vmem:[%s2641_s16 + $0x20] sm:$0xff]   ;;  %v2414_v13 = vld [vmem:[%s2641_s16 + $0x28] sm:$0xff]   ;;  %832 = vst [vmem:[#allocation2 + $0x1a0] sm:$0xff] %v2572_v24  ;;  %s3774_s24 = scalar_lea.vmem %s3851_s8, %s2247_s19 }
  0x14   : > { %2300 = vmatprep.subr.bf16.mxu0 %v2403_v2  ;;  %v2415_v14 = vld [vmem:[%s2641_s16 + $0x30] sm:$0xff]   ;;  %v2416_v15 = vld [vmem:[%s2641_s16 + $0x38] sm:$0xff]   ;;  %v2417_v16 = vld [vmem:[%s2641_s16 + $0x40] sm:$0xff]   ;;  %833 = vst [vmem:[#allocation2 + $0x1a8] sm:$0x3] %v2572_v24  ;;  %2346 = vmatprep.subr.bf16.mxu1 %v2426_v26  ;;  %v944_v41 = vsub.s32 0, %v943_v36 }
  0x15   : > { %v2418_v17 = vld [vmem:[%s2641_s16 + $0x48] sm:$0xff]   ;;  %v2419_v18 = vld [vmem:[%s2641_s16 + $0x50] sm:$0xff]   ;;  %v2420_v19 = vld [vmem:[%s2641_s16 + $0x58] sm:$0xff]   ;;  %837 = vst [vmem:[#allocation2 + $0x48] sm:$0x1] %v2572_v24  ;;  %v1184_v47 = vsub.s32 1, %v943_v36 }
  0x16   : > { %v2421_v20 = vld [vmem:[%s2641_s16 + $0x60] sm:$0xff]   ;;  %v2422_v21 = vld [vmem:[%s2641_s16 + $0x68] sm:$0xff]   ;;  %v2423_v22 = vld [vmem:[%s2641_s16 + $0x70] sm:$0xff]   ;;  %838 = vst [vmem:[#allocation2 + $0x60] sm:$0x1] %v2572_v24  ;;  %2347 = vmatpush3.bf16.msra.mxu1 %v2426_v26  ;;  %v1424_v52 = vsub.s32 2, %v943_v36 }
  0x17   : > { %2301 = vmatpush3.bf16.msra.mxu0 %v2403_v2  ;;  %v2424_v23 = vld [vmem:[%s2641_s16 + $0x78] sm:$0xff]   ;;  %839 = vst [vmem:[#allocation2 + $0x78] sm:$0x1] %v2572_v24  ;;  %840 = vst [vmem:[#allocation2 + $0x90] sm:$0x1] %v2572_v24  ;;  %2348 = vmatprep.subr.bf16.mxu1 %v2427_v27  ;;  %v2429_v29 = vld [vmem:[%s3849_s6 + $0x20] sm:$0xff]  }
  0x18   : > { %2302 = vmatprep.subr.bf16.mxu0 %v2404_v3  ;;  %841 = vst [vmem:[#allocation2 + $0xa8] sm:$0x1] %v2572_v24  ;;  %842 = vst [vmem:[#allocation2 + $0xc0] sm:$0x1] %v2572_v24  ;;  %v2428_v28 = vld [vmem:[%s3849_s6 + $0x18] sm:$0xff]   ;;  %v2430_v30 = vld [vmem:[%s3849_s6 + $0x28] sm:$0xff]  }
  0x19   : > { %843 = vst [vmem:[#allocation2 + $0xd8] sm:$0x1] %v2572_v24  ;;  %844 = vst [vmem:[#allocation2 + $0xf0] sm:$0x1] %v2572_v24  ;;  %v2431_v31 = vld [vmem:[%s3849_s6 + $0x30] sm:$0xff]   ;;  %v2432_v32 = vld [vmem:[%s3849_s6 + $0x38] sm:$0xff]  }
  0x1a   : > { %845 = vst [vmem:[#allocation2 + $0x108] sm:$0x1] %v2572_v24  ;;  %846 = vst [vmem:[#allocation2 + $0x120] sm:$0x1] %v2572_v24  ;;  %2349 = vmatpush3.bf16.msra.mxu1 %v2427_v27  ;;  %v2701_v34 = vld [vmem:[%s3845_s2] ss:$0 sm:$0xff] }
  0x1b   : > { %2303 = vmatpush3.bf16.msra.mxu0 %v2404_v3  ;;  %847 = vst [vmem:[#allocation2 + $0x138] sm:$0x1] %v2572_v24  ;;  %848 = vst [vmem:[#allocation2 + $0x150] sm:$0x1] %v2572_v24  ;;  %2350 = vmatprep.subr.bf16.mxu1 %v2428_v28  ;;  %v903_v49 = vld [vmem:[%s3846_s3] sm:$0x7] }
  0x1c   : > { %2304 = vmatprep.subr.bf16.mxu0 %v2405_v5  ;;  %849 = vst [vmem:[#allocation2 + $0x168] sm:$0x1] %v2572_v24  ;;  %850 = vst [vmem:[#allocation2 + $0x180] sm:$0x1] %v2572_v24  ;;  %v2710_v51 = vrot.slane %v903_v49, %v944_v41  ;;  %v904_v53 = vld [vmem:[%s3846_s3 + $0x4] sm:$0x7]  ;;  %v2715_v56 = vrot.slane %v903_v49, %v1184_v47  ;;  %v2729_v3 = vrot.slane %v903_v49, %v1424_v52 }
  0x1d   : > { %855 = vst [vmem:[#allocation2 + $0x59] sm:$0x1] %v2572_v24  ;;  %856 = vst [vmem:[#allocation2 + $0x71] sm:$0x1] %v2572_v24  ;;  %v2718_v59 = vrot.slane %v904_v53, %v944_v41  ;;  %v1146_v60 = vld [vmem:[#allocation2 + $0x1] sm:$0xff]  ;;  %v1147_v61 = vld [vmem:[#allocation2 + $0x9] sm:$0xff]  ;;  %v2727_v2 = vrot.slane %v904_v53, %v1184_v47 }
  0x1e   : > { %857 = vst [vmem:[#allocation2 + $0x89] sm:$0x1] %v2572_v24  ;;  %858 = vst [vmem:[#allocation2 + $0xa1] sm:$0x1] %v2572_v24  ;;  %2351 = vmatpush3.bf16.msra.mxu1 %v2428_v28  ;;  %v905_v0 = vld [vmem:[%s3846_s3 + $0x8] sm:$0x7] }
  0x1f   : > { %2305 = vmatpush3.bf16.msra.mxu0 %v2405_v5  ;;  %859 = vst [vmem:[#allocation2 + $0xb9] sm:$0x1] %v2572_v24  ;;  %860 = vst [vmem:[#allocation2 + $0xd1] sm:$0x1] %v2572_v24  ;;  %2352 = vmatprep.subr.bf16.mxu1 %v2429_v29 }
  0x20   : > { %2306 = vmatprep.subr.bf16.mxu0 %v2406_v6  ;;  %861 = vst [vmem:[#allocation2 + $0xe9] sm:$0x1] %v2572_v24  ;;  %862 = vst [vmem:[#allocation2 + $0x101] sm:$0x1] %v2572_v24 }
  0x21   : > { %863 = vst [vmem:[#allocation2 + $0x119] sm:$0x1] %v2572_v24  ;;  %864 = vst [vmem:[#allocation2 + $0x131] sm:$0x1] %v2572_v24 }
  0x22   : > { %865 = vst [vmem:[#allocation2 + $0x149] sm:$0x1] %v2572_v24  ;;  %866 = vst [vmem:[#allocation2 + $0x161] sm:$0x1] %v2572_v24  ;;  %2353 = vmatpush3.bf16.msra.mxu1 %v2429_v29 }
  0x23   : > { %2307 = vmatpush3.bf16.msra.mxu0 %v2406_v6  ;;  %867 = vst [vmem:[#allocation2 + $0x179] sm:$0x1] %v2572_v24  ;;  %868 = vst [vmem:[#allocation2 + $0x191] sm:$0x1] %v2572_v24  ;;  %2354 = vmatprep.subr.bf16.mxu1 %v2430_v30 }
  0x24   : > { %2308 = vmatprep.subr.bf16.mxu0 %v2407_v7  ;;  %834 = vst [vmem:[#allocation2] sm:$0x1] %v2572_v24  ;;  %852 = vst [vmem:[#allocation2 + $0x11] sm:$0x1] %v2572_v24 }
  0x25   : > { %851 = vst [vmem:[#allocation2 + $0x198] sm:$0x1] %v2572_v24  ;;  %869 = vst [vmem:[#allocation2 + $0x1a9] sm:$0x1] %v2572_v24  ;;  %v2754_v24 = vrot.slane %v905_v0, %v1424_v52 }
  0x26   : > { %2355 = vmatpush3.bf16.msra.mxu1 %v2430_v30  ;;  %3860 = vst [vmem:[#allocation3_spill] sm:$0xff] %v2715_v56  ;;  %3861 = vst [vmem:[#allocation4_spill] sm:$0xff] %v2729_v3 }
  0x27   : > { %2309 = vmatpush3.bf16.msra.mxu0 %v2407_v7  ;;  %2356 = vmatprep.subr.bf16.mxu1 %v2431_v31  ;;  %v2733_v7 = vmul.f32 0.0, %v2710_v51 }
  0x28   : > { %2310 = vmatprep.subr.bf16.mxu0 %v2408_v8 }
  0x2a   : > { %2357 = vmatpush3.bf16.msra.mxu1 %v2431_v31 }
  0x2b   : > { %2311 = vmatpush3.bf16.msra.mxu0 %v2408_v8  ;;  %2358 = vmatprep.subr.bf16.mxu1 %v2432_v32  ;;  %v906_v54 = vld [vmem:[#allocation2] sm:$0xff]  ;;  %v2735_v8 = vrot.slane %v905_v0, %v944_v41 }
  0x2c   : > { %v2725_v1 = vmul.f32 %v2710_v51, %v906_v54 }
  0x2e   : > { %2313 = vmatmul.mubr.bf16.vlgmr.msra.gmra.mrb[0].mxu0 %v2410_v9  ;;  %2359 = vmatpush3.bf16.msra.mxu1 %v2432_v32  ;;  %v1386_v9 = vld [vmem:[#allocation2 + $0x2] sm:$0xff] }
  0x2f   : > { %2316 = vmatprep.mubr.bf16.mxu0 %v2411_v10  ;;  %v1387_v10 = vld [vmem:[#allocation2 + $0xa] sm:$0xff] }
  0x36   : > { %2317 = vmatmul.mubr.bf16.gmra.mrb[4].mxu0 %v2412_v11 }
  0x37   : > { %2320 = vmatprep.mubr.bf16.mxu0 %v2413_v12 }
  0x3e   : > { %2321 = vmatmul.mubr.bf16.gmra.mrb[8].mxu0 %v2414_v13  ;;  %v2739_v13 = vmul.f32 %v2715_v56, %v1146_v60 }
  0x3f   : > { %2324 = vmatprep.mubr.bf16.mxu0 %v2415_v14  ;;  %v2742_v14 = vmul.f32 %v2715_v56, %v1147_v61 }
  0x46   : > { %2325 = vmatmul.mubr.bf16.gmra.mrb[12].mxu0 %v2416_v15 }
  0x47   : > { %2328 = vmatprep.mubr.bf16.mxu0 %v2417_v16  ;;  %v2744_v16 = vrot.slane %v905_v0, %v1184_v47 }
  0x4e   : > { %2329 = vmatmul.mubr.bf16.gmra.mrb[16].mxu0 %v2418_v17  ;;  %v2746_v17 = vrot.slane %v904_v53, %v1424_v52 }
  0x4f   : > { %2332 = vmatprep.mubr.bf16.mxu0 %v2419_v18 }
  0x56   : > { %2333 = vmatmul.mubr.bf16.gmra.mrb[20].mxu0 %v2420_v19  ;;  %v2749_v19 = vmul.f32 %v2729_v3, %v1386_v9 }
  0x57   : > { %2336 = vmatprep.mubr.bf16.mxu0 %v2421_v20  ;;  %v2752_v20 = vmul.f32 %v2729_v3, %v1387_v10 }
  0x5e   : > { %2337 = vmatmul.mubr.bf16.gmra.mrb[24].mxu0 %v2422_v21 }
  0x5f   : > { %2340 = vmatprep.mubr.bf16.mxu0 %v2423_v22 }
  0x66   : > { %2341 = vmatmul.mubr.bf16.gmra.mrb[28].mxu0 %v2424_v23 }
 0x101   : > { %v2314_v35 = vpop.f32.mrb[0].mxu0 }
 0x102   : > { %v549_v37 = vadd.f32 %v2314_v35, %v2701_v34  ;;  %v540_v38 = vpop.f32.mrb[1].mxu0 }
 0x103   : > { %v541_v39 = vadd.f32 %v2701_v34, %v540_v38  ;;  %v2315_v40 = vpop.f32.mrb[2].mxu0 }
 0x104   : > { %v701_v42 = vmul.f32 0.70710677, %v549_v37  ;;  %v552_v43 = vadd.f32 %v2315_v40, %v2701_v34  ;;  %v543_v44 = vpop.f32.mrb[3].mxu0  ;;  %v669_v22 = vmul.f32 0.5, %v549_v37 }
 0x105   : > { %v699_v45 = vmul.f32 0.70710677, %v541_v39  ;;  %v544_v46 = vadd.f32 %v2701_v34, %v543_v44  ;;  %v667_v23 = vmul.f32 0.5, %v541_v39 }
 0x106   : > { %2433 = verf.f32 %v701_v42  ;;  %v702_v48 = vmul.f32 0.70710677, %v552_v43  ;;  %v670_v27 = vmul.f32 0.5, %v552_v43 }
 0x107   : > { %2435 = verf.f32 %v699_v45  ;;  %v700_v50 = vmul.f32 0.70710677, %v544_v46  ;;  %v668_v28 = vmul.f32 0.5, %v544_v46 }
 0x108   : > { %2437 = verf.f32 %v702_v48 }
 0x109   : > { %2439 = verf.f32 %v700_v50  ;;  %v2318_v55 = vpop.f32.mrb[4].mxu0 }
 0x10a   : > { %v565_v57 = vadd.f32 %v2318_v55, %v2701_v34  ;;  %v556_v58 = vpop.f32.mrb[5].mxu0 }
 0x10b   : > { %v557_v62 = vadd.f32 %v2701_v34, %v556_v58  ;;  %v2319_v63 = vpop.f32.mrb[6].mxu0 }
 0x10c   : > { %v705_v4 = vmul.f32 0.70710677, %v565_v57  ;;  %v568_v5 = vadd.f32 %v2319_v63, %v2701_v34  ;;  %v559_v6 = vpop.f32.mrb[7].mxu0  ;;  %v673_v32 = vmul.f32 0.5, %v565_v57 }
 0x10d   : > { %v703_v11 = vmul.f32 0.70710677, %v557_v62  ;;  %v560_v12 = vadd.f32 %v2701_v34, %v559_v6  ;;  %v671_v33 = vmul.f32 0.5, %v557_v62 }
 0x10e   : > { %2441 = verf.f32 %v705_v4  ;;  %v706_v15 = vmul.f32 0.70710677, %v568_v5  ;;  %v674_v39 = vmul.f32 0.5, %v568_v5 }
 0x10f   : > { %2443 = verf.f32 %v703_v11  ;;  %v704_v18 = vmul.f32 0.70710677, %v560_v12  ;;  %v672_v45 = vmul.f32 0.5, %v560_v12 }
 0x110   : > { %v2434_v21 = vpop.eup %2433  ;;  %2445 = verf.f32 %v706_v15 }
 0x111   : > { %v2436_v25 = vpop.eup %2435  ;;  %v765_v26 = vadd.f32 1.0, %v2434_v21  ;;  %2447 = verf.f32 %v704_v18  ;;  %v2322_v29 = vpop.f32.mrb[8].mxu0 }
 0x112   : > { %v2438_v30 = vpop.eup %2437  ;;  %v763_v31 = vadd.f32 1.0, %v2436_v25  ;;  %v581_v35 = vadd.f32 %v2322_v29, %v2701_v34  ;;  %v572_v36 = vpop.f32.mrb[9].mxu0 }
 0x113   : > { %v2440_v38 = vpop.eup %2439  ;;  %v2757_v40 = vmul.f32 %v765_v26, %v669_v22  ;;  %v766_v37 = vadd.f32 1.0, %v2438_v30  ;;  %v573_v41 = vadd.f32 %v2701_v34, %v572_v36  ;;  %v2323_v42 = vpop.f32.mrb[10].mxu0 }
 0x114   : > { %v795_v44 = vmul.f32 %v763_v31, %v667_v23  ;;  %v764_v43 = vadd.f32 1.0, %v2440_v38  ;;  %v709_v46 = vmul.f32 0.70710677, %v581_v35  ;;  %v575_v47 = vpop.f32.mrb[11].mxu0  ;;  %v2763_v49 = vmul.f32 0.5, %v581_v35 }
 0x115   : > { %873 = vst [vmem:[#allocation2 + $0x31] sm:$0xff] %v2757_v40  ;;  %v2761_v48 = vmul.f32 %v766_v37, %v670_v27  ;;  %v707_v50 = vmul.f32 0.70710677, %v573_v41  ;;  %v584_v52 = vadd.f32 %v2323_v42, %v2701_v34  ;;  %v2766_v54 = vmul.f32 0.5, %v573_v41 }
 0x116   : > { %871 = vst [vmem:[#allocation2 + $0x19] sm:$0xff] %v795_v44  ;;  %v796_v53 = vmul.f32 %v764_v43, %v668_v28  ;;  %2449 = verf.f32 %v709_v46  ;;  %v576_v55 = vadd.f32 %v2701_v34, %v575_v47  ;;  %v2773_v60 = vmul.f32 %v2715_v56, %v795_v44 }
 0x117   : > { %874 = vst [vmem:[#allocation2 + $0x39] sm:$0xff] %v2761_v48  ;;  %2451 = verf.f32 %v707_v50  ;;  %v2770_v57 = vmul.f32 0.5, %v584_v52  ;;  %v710_v58 = vmul.f32 0.70710677, %v584_v52  ;;  %v2782_v4 = vmul.f32 %v2715_v56, %v2757_v40 }
 0x118   : > { %v2442_v61 = vpop.eup %2441  ;;  %872 = vst [vmem:[#allocation2 + $0x21] sm:$0xff] %v796_v53  ;;  %v2775_v62 = vmul.f32 0.5, %v576_v55  ;;  %v708_v63 = vmul.f32 0.70710677, %v576_v55  ;;  %v2778_v0 = vmul.f32 %v2715_v56, %v796_v53  ;;  %v2786_v10 = vmul.f32 %v2715_v56, %v2761_v48 }
 0x119   : > { %v2444_v5 = vpop.eup %2443  ;;  %v769_v6 = vadd.f32 1.0, %v2442_v61  ;;  %2453 = verf.f32 %v710_v58  ;;  %v2326_v9 = vpop.f32.mrb[12].mxu0  ;;  %v2789_v11 = vmul.f32 %v2727_v2, %v795_v44  ;;  %v2793_v22 = vmul.f32 %v2727_v2, %v796_v53 }
 0x11a   : > { %v2446_v12 = vpop.eup %2445  ;;  %v767_v15 = vadd.f32 1.0, %v2444_v5  ;;  %2455 = verf.f32 %v708_v63  ;;  %v597_v18 = vadd.f32 %v2326_v9, %v2701_v34  ;;  %v588_v21 = vpop.f32.mrb[13].mxu0  ;;  %v2800_v29 = vmul.f32 %v2727_v2, %v2757_v40 }
 0x11b   : > { %v2448_v23 = vpop.eup %2447  ;;  %v2795_v25 = vmul.f32 %v769_v6, %v673_v32  ;;  %v770_v26 = vadd.f32 1.0, %v2446_v12  ;;  %v589_v27 = vadd.f32 %v2701_v34, %v588_v21  ;;  %v2327_v28 = vpop.f32.mrb[14].mxu0  ;;  %v2806_v38 = vmul.f32 %v2727_v2, %v2761_v48 }
 0x11c   : > { %v2802_v30 = vmul.f32 %v767_v15, %v671_v33  ;;  %v768_v31 = vadd.f32 1.0, %v2448_v23  ;;  %v713_v35 = vmul.f32 0.70710677, %v597_v18  ;;  %v591_v36 = vpop.f32.mrb[15].mxu0  ;;  %v2811_v37 = vmul.f32 0.5, %v597_v18  ;;  %v910_v43 = vld [vmem:[#allocation2 + $0x30] sm:$0xff] }
 0x11d   : > { %877 = vst [vmem:[#allocation2 + $0x61] sm:$0xff] %v2795_v25  ;;  %v2809_v32 = vmul.f32 %v770_v26, %v674_v39  ;;  %v711_v41 = vmul.f32 0.70710677, %v589_v27  ;;  %v600_v42 = vadd.f32 %v2327_v28, %v2701_v34  ;;  %v908_v44 = vld [vmem:[#allocation2 + $0x18] sm:$0xff]  ;;  %v2817_v46 = vmul.f32 0.5, %v589_v27 }
 0x11e   : > { %875 = vst [vmem:[#allocation2 + $0x49] sm:$0xff] %v2802_v30  ;;  %v2815_v33 = vmul.f32 %v768_v31, %v672_v45  ;;  %2457 = verf.f32 %v713_v35  ;;  %v592_v47 = vadd.f32 %v2701_v34, %v591_v36  ;;  %v911_v50 = vld [vmem:[#allocation2 + $0x38] sm:$0xff]  ;;  %v2824_v55 = vmul.f32 %v2710_v51, %v908_v44 }
 0x11f   : > { %878 = vst [vmem:[#allocation2 + $0x69] sm:$0xff] %v2809_v32  ;;  %2459 = verf.f32 %v711_v41  ;;  %v2821_v39 = vmul.f32 0.5, %v600_v42  ;;  %v714_v52 = vmul.f32 0.70710677, %v600_v42  ;;  %v909_v53 = vld [vmem:[#allocation2 + $0x20] sm:$0xff]  ;;  %v2833_v5 = vmul.f32 %v2710_v51, %v910_v43 }
 0x120   : > { %v2450_v58 = vpop.eup %2449  ;;  %876 = vst [vmem:[#allocation2 + $0x51] sm:$0xff] %v2815_v33  ;;  %v2827_v45 = vmul.f32 0.5, %v592_v47  ;;  %v712_v61 = vmul.f32 0.70710677, %v592_v47  ;;  %v2830_v63 = vmul.f32 %v2710_v51, %v909_v53  ;;  %v2836_v15 = vmul.f32 %v2710_v51, %v911_v50 }
 0x121   : > { %v2452_v6 = vpop.eup %2451  ;;  %v773_v9 = vadd.f32 1.0, %v2450_v58  ;;  %2461 = verf.f32 %v714_v52  ;;  %v2330_v12 = vpop.f32.mrb[16].mxu0  ;;  %v982_v18 = vmul.f32 %v2718_v59, %v908_v44  ;;  %v983_v27 = vmul.f32 %v2718_v59, %v909_v53 }
 0x122   : > { %v771_v21 = vadd.f32 1.0, %v2452_v6  ;;  %2463 = verf.f32 %v712_v61  ;;  %v613_v23 = vadd.f32 %v2330_v12, %v2701_v34  ;;  %v604_v26 = vpop.f32.mrb[17].mxu0  ;;  %v2844_v41 = vmul.f32 %v2718_v59, %v910_v43 }
 0x123   : > { %v2454_v28 = vpop.eup %2453  ;;  %v805_v31 = vmul.f32 %v773_v9, %v2763_v49  ;;  %v605_v35 = vadd.f32 %v2701_v34, %v604_v26  ;;  %v2331_v36 = vpop.f32.mrb[18].mxu0  ;;  %v2847_v42 = vmul.f32 %v2718_v59, %v911_v50  ;;  %v1014_v53 = vadd.f32 %v982_v18, %v2725_v1 }
 0x124   : > { %v2456_v44 = vpop.eup %2455  ;;  %v2850_v47 = vmul.f32 %v771_v21, %v2766_v54  ;;  %v774_v52 = vadd.f32 1.0, %v2454_v28  ;;  %v717_v58 = vmul.f32 0.70710677, %v613_v23  ;;  %v607_v61 = vpop.f32.mrb[19].mxu0  ;;  %v2853_v6 = vmul.f32 0.5, %v613_v23 }
 0x125   : > { %881 = vst [vmem:[#allocation2 + $0x91] sm:$0xff] %v805_v31  ;;  %v772_v49 = vadd.f32 1.0, %v2456_v44  ;;  %v715_v9 = vmul.f32 0.70710677, %v605_v35  ;;  %v616_v12 = vadd.f32 %v2331_v36, %v2701_v34  ;;  %v2858_v56 = vmul.f32 0.5, %v605_v35 }
 0x126   : > { %3862 = vst [vmem:[#allocation5_spill] sm:$0xff] %v2850_v47  ;;  %879 = vst [vmem:[#allocation2 + $0x79] sm:$0xff] %v2850_v47  ;;  %v806_v26 = vmul.f32 %v774_v52, %v2770_v57  ;;  %2465 = verf.f32 %v717_v58  ;;  %v608_v54 = vadd.f32 %v2701_v34, %v607_v61  ;;  %v1015_v18 = vadd.f32 %v983_v27, %v2733_v7 }
 0x127   : > { %v2862_v21 = vmul.f32 %v772_v49, %v2775_v62  ;;  %2467 = verf.f32 %v715_v9  ;;  %v718_v1 = vmul.f32 0.70710677, %v616_v12  ;;  %v2865_v28 = vmul.f32 0.5, %v616_v12 }
 0x128   : > { %v2458_v23 = vpop.eup %2457  ;;  %882 = vst [vmem:[#allocation2 + $0x99] sm:$0xff] %v806_v26  ;;  %v2867_v31 = vmul.f32 0.5, %v608_v54  ;;  %v716_v36 = vmul.f32 0.70710677, %v608_v54  ;;  %v1050_v57 = vmul.f32 %v2735_v8, %v910_v43  ;;  %v1051_v52 = vmul.f32 %v2735_v8, %v911_v50 }
 0x129   : > { %3863 = vst [vmem:[#allocation6_spill] sm:$0xff] %v2862_v21  ;;  %v2460_v35 = vpop.eup %2459  ;;  %880 = vst [vmem:[#allocation2 + $0x81] sm:$0xff] %v2862_v21  ;;  %v777_v44 = vadd.f32 1.0, %v2458_v23  ;;  %2469 = verf.f32 %v718_v1  ;;  %v2334_v62 = vpop.f32.mrb[20].mxu0  ;;  %v1254_v7 = vadd.f32 %v2789_v11, %v2739_v13  ;;  %v1255_v49 = vadd.f32 %v2793_v22, %v2742_v14 }
 0x12a   : > { %v775_v27 = vadd.f32 1.0, %v2460_v35  ;;  %2471 = verf.f32 %v716_v36  ;;  %v629_v58 = vadd.f32 %v2334_v62, %v2701_v34  ;;  %v620_v61 = vpop.f32.mrb[21].mxu0  ;;  %v1082_v54 = vadd.f32 %v1050_v57, %v1014_v53  ;;  %v1388_v57 = vld [vmem:[#allocation2 + $0x1a] sm:$0xff] }
 0x12b   : > { %v2462_v43 = vpop.eup %2461  ;;  %v809_v9 = vmul.f32 %v777_v44, %v2811_v37  ;;  %v621_v12 = vadd.f32 %v2701_v34, %v620_v61  ;;  %v2335_v26 = vpop.f32.mrb[22].mxu0  ;;  %v1083_v1 = vadd.f32 %v1051_v52, %v1015_v18  ;;  %v1290_v35 = vmul.f32 %v2744_v16, %v2757_v40 }
 0x12c   : > { %v2464_v50 = vpop.eup %2463  ;;  %v807_v23 = vmul.f32 %v775_v27, %v2817_v46  ;;  %v778_v13 = vadd.f32 1.0, %v2462_v43  ;;  %v721_v11 = vmul.f32 0.70710677, %v629_v58  ;;  %v623_v36 = vpop.f32.mrb[23].mxu0  ;;  %v2882_v14 = vmul.f32 0.5, %v629_v58  ;;  %v1389_v27 = vld [vmem:[#allocation2 + $0x22] sm:$0xff] }
 0x12d   : > { %885 = vst [vmem:[#allocation2 + $0xc1] sm:$0xff] %v809_v9  ;;  %v776_v62 = vadd.f32 1.0, %v2464_v50  ;;  %v719_v22 = vmul.f32 0.70710677, %v621_v12  ;;  %v632_v37 = vadd.f32 %v2335_v26, %v2701_v34  ;;  %v624_v18 = vadd.f32 %v2701_v34, %v623_v36 }
 0x12e   : > { %883 = vst [vmem:[#allocation2 + $0xa9] sm:$0xff] %v807_v23  ;;  %v810_v53 = vmul.f32 %v778_v13, %v2821_v39  ;;  %2473 = verf.f32 %v721_v11  ;;  %v1291_v46 = vmul.f32 %v2744_v16, %v2761_v48  ;;  %v2890_v40 = vmul.f32 0.5, %v621_v12 }
 0x12f   : > { %v808_v44 = vmul.f32 %v776_v62, %v2827_v45  ;;  %2475 = verf.f32 %v719_v22  ;;  %v722_v52 = vmul.f32 0.70710677, %v632_v37  ;;  %v2892_v61 = vmul.f32 0.5, %v632_v37  ;;  %v2896_v45 = vld [vmem:[#allocation2 + $0x32] sm:$0xff] }
 0x130   : > { %v2466_v58 = vpop.eup %2465  ;;  %886 = vst [vmem:[#allocation2 + $0xc9] sm:$0xff] %v810_v53  ;;  %v720_v43 = vmul.f32 0.70710677, %v624_v18  ;;  %v1322_v39 = vadd.f32 %v1290_v35, %v1254_v7  ;;  %v1323_v9 = vadd.f32 %v1291_v46, %v1255_v49  ;;  %v2894_v48 = vmul.f32 0.5, %v624_v18 }
 0x131   : > { %v2468_v26 = vpop.eup %2467  ;;  %884 = vst [vmem:[#allocation2 + $0xb1] sm:$0xff] %v808_v44  ;;  %v781_v50 = vadd.f32 1.0, %v2466_v58  ;;  %2477 = verf.f32 %v722_v52  ;;  %v2338_v23 = vpop.f32.mrb[24].mxu0  ;;  %v2899_v12 = vmul.f32 %v2729_v3, %v1388_v57  ;;  %v2903_v7 = vmul.f32 %v2729_v3, %v1389_v27 }
 0x132   : > { %v779_v13 = vadd.f32 1.0, %v2468_v26  ;;  %2479 = verf.f32 %v720_v43  ;;  %v645_v11 = vadd.f32 %v2338_v23, %v2701_v34  ;;  %v636_v36 = vpop.f32.mrb[25].mxu0  ;;  %v2907_v37 = vadd.f32 %v1322_v39, %v1082_v54  ;;  %v1391_v43 = vld [vmem:[#allocation2 + $0x3a] sm:$0xff] }
 0x133   : > { %v2470_v49 = vpop.eup %2469  ;;  %v813_v35 = vmul.f32 %v781_v50, %v2853_v6  ;;  %v637_v62 = vadd.f32 %v2701_v34, %v636_v36  ;;  %v2339_v22 = vpop.f32.mrb[26].mxu0  ;;  %v2909_v53 = vadd.f32 %v1323_v9, %v1083_v1  ;;  %v2914_v26 = vmul.f32 %v2729_v3, %v2896_v45 }
 0x134   : > { %v2472_v18 = vpop.eup %2471  ;;  %v811_v46 = vmul.f32 %v779_v13, %v2858_v56  ;;  %v782_v44 = vadd.f32 1.0, %v2470_v49  ;;  %v725_v52 = vmul.f32 0.70710677, %v645_v11  ;;  %v639_v58 = vpop.f32.mrb[27].mxu0  ;;  %v2916_v50 = vmul.f32 0.5, %v645_v11 }
 0x135   : > { %889 = vst [vmem:[#allocation2 + $0xf1] sm:$0xff] %v813_v35  ;;  %v780_v6 = vadd.f32 1.0, %v2472_v18  ;;  %v723_v23 = vmul.f32 0.70710677, %v637_v62  ;;  %v648_v54 = vadd.f32 %v2339_v22, %v2701_v34  ;;  %v2920_v56 = vmul.f32 0.5, %v637_v62 }
 0x136   : > { %887 = vst [vmem:[#allocation2 + $0xd9] sm:$0xff] %v811_v46  ;;  %v814_v1 = vmul.f32 %v782_v44, %v2865_v28  ;;  %2481 = verf.f32 %v725_v52  ;;  %v640_v39 = vadd.f32 %v2701_v34, %v639_v58  ;;  %v2925_v36 = vmul.f32 %v2729_v3, %v1391_v43 }
 0x137   : > { %v812_v9 = vmul.f32 %v780_v6, %v2867_v31  ;;  %2483 = verf.f32 %v723_v23  ;;  %v726_v13 = vmul.f32 0.70710677, %v648_v54  ;;  %v2927_v49 = vmul.f32 0.5, %v648_v54 }
 0x138   : > { %v2474_v11 = vpop.eup %2473  ;;  %890 = vst [vmem:[#allocation2 + $0xf9] sm:$0xff] %v814_v1  ;;  %v724_v35 = vmul.f32 0.70710677, %v640_v39  ;;  %v1462_v22 = vmul.f32 %v2746_v17, %v1388_v57  ;;  %v1463_v28 = vmul.f32 %v2746_v17, %v1389_v27  ;;  %v2931_v46 = vmul.f32 0.5, %v640_v39 }
 0x139   : > { %v2476_v62 = vpop.eup %2475  ;;  %888 = vst [vmem:[#allocation2 + $0xe1] sm:$0xff] %v812_v9  ;;  %v785_v18 = vadd.f32 1.0, %v2474_v11  ;;  %2485 = verf.f32 %v726_v13  ;;  %v2342_v31 = vpop.f32.mrb[28].mxu0  ;;  %v2935_v44 = vmul.f32 %v2746_v17, %v2896_v45  ;;  %v2939_v57 = vmul.f32 %v2746_v17, %v1391_v43 }
 0x13a   : > { %v783_v52 = vadd.f32 1.0, %v2476_v62  ;;  %2487 = verf.f32 %v724_v35  ;;  %v661_v58 = vadd.f32 %v2342_v31, %v2701_v34  ;;  %v652_v6 = vpop.f32.mrb[29].mxu0  ;;  %v1494_v39 = vadd.f32 %v1462_v22, %v2749_v19 }
 0x13b   : > { %v2478_v27 = vpop.eup %2477  ;;  %v817_v23 = vmul.f32 %v785_v18, %v2882_v14  ;;  %v653_v54 = vadd.f32 %v2701_v34, %v652_v6  ;;  %v2343_v1 = vpop.f32.mrb[30].mxu0  ;;  %v1495_v9 = vadd.f32 %v1463_v28, %v2752_v20  ;;  %v1530_v3 = vmul.f32 %v2754_v24, %v2896_v45 }
 0x13c   : > { %v2480_v13 = vpop.eup %2479  ;;  %v815_v11 = vmul.f32 %v783_v52, %v2890_v40  ;;  %v786_v35 = vadd.f32 1.0, %v2478_v27  ;;  %v729_v62 = vmul.f32 0.70710677, %v661_v58  ;;  %v655_v31 = vpop.f32.mrb[31].mxu0  ;;  %v2948_v47 = vmul.f32 0.5, %v661_v58 }
 0x13d   : > { %893 = vst [vmem:[#allocation2 + $0x121] sm:$0xff] %v817_v23  ;;  %v784_v21 = vadd.f32 1.0, %v2480_v13  ;;  %v727_v14 = vmul.f32 0.70710677, %v653_v54  ;;  %v664_v18 = vadd.f32 %v2343_v1, %v2701_v34  ;;  %v656_v20 = vadd.f32 %v2701_v34, %v655_v31  ;;  %v2959_v1 = vld [vmem:[#allocation2 + $0x48] sm:$0xff] }
 0x13e   : > { %891 = vst [vmem:[#allocation2 + $0x109] sm:$0xff] %v815_v11  ;;  %v818_v19 = vmul.f32 %v786_v35, %v2892_v61  ;;  %2489 = verf.f32 %v729_v62  ;;  %v1531_v40 = vmul.f32 %v2754_v24, %v1391_v43  ;;  %v2955_v28 = vmul.f32 0.5, %v653_v54  ;;  %v2961_v61 = vld [vmem:[#allocation2 + $0x50] sm:$0xff]  ;;  %v2978_v35 = vld [vmem:[%s3848_s5] ss:$0 sm:$0xff] }
 0x13f   : > { %v816_v22 = vmul.f32 %v784_v21, %v2894_v48  ;;  %2491 = verf.f32 %v727_v14  ;;  %v730_v45 = vmul.f32 0.70710677, %v664_v18  ;;  %v2957_v58 = vmul.f32 0.5, %v664_v18  ;;  %v2968_v48 = vld [vmem:[%s3847_s4] ss:$0 sm:$0xff] }
 0x140   : > { %v2482_v52 = vpop.eup %2481  ;;  %894 = vst [vmem:[#allocation2 + $0x129] sm:$0xff] %v818_v19  ;;  %v728_v6 = vmul.f32 0.70710677, %v656_v20  ;;  %v1562_v27 = vadd.f32 %v1530_v3, %v1494_v39  ;;  %v1563_v23 = vadd.f32 %v1531_v40, %v1495_v9  ;;  %v2963_v21 = vmul.f32 0.5, %v656_v20 }
 0x141   : > { %v2484_v34 = vpop.eup %2483  ;;  %892 = vst [vmem:[#allocation2 + $0x111] sm:$0xff] %v816_v22  ;;  %v789_v43 = vadd.f32 1.0, %v2482_v52  ;;  %2493 = verf.f32 %v730_v45  ;;  %v1016_v54 = vadd.f32 %v2844_v41, %v2824_v55  ;;  %v1052_v62 = vmul.f32 %v2735_v8, %v2959_v1  ;;  %v2998_v45 = vld [vmem:[#allocation2 + $0x4a] sm:$0xff] }
 0x142   : > { %v787_v3 = vadd.f32 1.0, %v2484_v34  ;;  %2495 = verf.f32 %v728_v6  ;;  %v1594_v39 = vadd.f32 %v1562_v27, %v2907_v37  ;;  %v1595_v9 = vadd.f32 %v1563_v23, %v2909_v53 }
 0x143   : > { %v2486_v13 = vpop.eup %2485  ;;  %v821_v11 = vmul.f32 %v789_v43, %v2916_v50  ;;  %v1053_v55 = vmul.f32 %v2735_v8, %v2961_v61  ;;  %v1256_v41 = vadd.f32 %v2800_v29, %v2773_v60  ;;  %v1017_v19 = vadd.f32 %v2847_v42, %v2830_v63  ;;  %v3003_v42 = vld [vmem:[#allocation2 + $0x52] sm:$0xff] }
 0x144   : > { %v2488_v37 = vpop.eup %2487  ;;  %v819_v53 = vmul.f32 %v787_v3, %v2920_v56  ;;  %v790_v31 = vadd.f32 1.0, %v2486_v13  ;;  %v1633_v50 = vmul.f32 %v2968_v48, %v1594_v39  ;;  %v1634_v14 = vmul.f32 %v2968_v48, %v1595_v9 }
 0x145   : > { %897 = vst [vmem:[#allocation2 + $0x151] sm:$0xff] %v821_v11  ;;  %v788_v18 = vadd.f32 1.0, %v2488_v37  ;;  %v1084_v20 = vadd.f32 %v1052_v62, %v1016_v54  ;;  %v1257_v40 = vadd.f32 %v2806_v38, %v2778_v0  ;;  %v1292_v22 = vmul.f32 %v2744_v16, %v2802_v30  ;;  %v3018_v62 = vld [vmem:[#allocation2 + $0x60] sm:$0xff] }
 0x146   : > { %895 = vst [vmem:[#allocation2 + $0x139] sm:$0xff] %v819_v53  ;;  %v822_v60 = vmul.f32 %v790_v31, %v2927_v49  ;;  %v1672_v29 = vadd.f32 %v2978_v35, %v1633_v50  ;;  %v1673_v56 = vadd.f32 %v2978_v35, %v1634_v14  ;;  %v1085_v6 = vadd.f32 %v1053_v55, %v1017_v19  ;;  %v3021_v50 = vld [vmem:[#allocation2 + $0x68] sm:$0xff] }
 0x147   : > { %v820_v52 = vmul.f32 %v788_v18, %v2931_v46  ;;  %v1293_v63 = vmul.f32 %v2744_v16, %v2815_v33  ;;  %v1496_v0 = vadd.f32 %v2935_v44, %v2899_v12  ;;  %v1497_v34 = vadd.f32 %v2939_v57, %v2903_v7 }
 0x148   : > { %v2490_v38 = vpop.eup %2489  ;;  %898 = vst [vmem:[#allocation2 + $0x159] sm:$0xff] %v822_v60  ;;  %v3007_v49 = vmul.f32 0.5, %v1672_v29  ;;  %v1736_v27 = vmul.f32 0.70710677, %v1672_v29  ;;  %v1737_v23 = vmul.f32 0.70710677, %v1673_v56  ;;  %v1324_v54 = vadd.f32 %v1292_v22, %v1256_v41 }
 0x149   : > { %v2492_v43 = vpop.eup %2491  ;;  %896 = vst [vmem:[#allocation2 + $0x141] sm:$0xff] %v820_v52  ;;  %v793_v46 = vadd.f32 1.0, %v2490_v38  ;;  %v1325_v3 = vadd.f32 %v1293_v63, %v1257_v40  ;;  %v1532_v39 = vmul.f32 %v2754_v24, %v2998_v45  ;;  %v1533_v12 = vmul.f32 %v2754_v24, %v3003_v42 }
 0x14a   : > { %v791_v9 = vadd.f32 1.0, %v2492_v43  ;;  %2497 = verf.f32 %v1736_v27  ;;  %v986_v44 = vmul.f32 %v2718_v59, %v2959_v1  ;;  %v1356_v7 = vadd.f32 %v1324_v54, %v1084_v20  ;;  %v3044_v27 = vld [vmem:[#allocation2 + $0x6a] sm:$0xff] }
 0x14b   : > { %v2494_v13 = vpop.eup %2493  ;;  %v825_v11 = vmul.f32 %v793_v46, %v2948_v47  ;;  %2499 = verf.f32 %v1737_v23  ;;  %v1357_v57 = vadd.f32 %v1325_v3, %v1085_v6  ;;  %v1564_v53 = vadd.f32 %v1532_v39, %v1496_v0  ;;  %v3039_v0 = vld [vmem:[#allocation2 + $0x62] sm:$0xff] }
 0x14c   : > { %v2496_v55 = vpop.eup %2495  ;;  %v823_v41 = vmul.f32 %v791_v9, %v2955_v28  ;;  %v794_v37 = vadd.f32 1.0, %v2494_v13  ;;  %v1565_v31 = vadd.f32 %v1533_v12, %v1497_v34  ;;  %v1705_v18 = vmul.f32 0.5, %v1673_v56 }
 0x14d   : > { %901 = vst [vmem:[#allocation2 + $0x181] sm:$0xff] %v825_v11  ;;  %v792_v14 = vadd.f32 1.0, %v2496_v55  ;;  %v987_v19 = vmul.f32 %v2718_v59, %v2961_v61  ;;  %v1018_v47 = vadd.f32 %v986_v44, %v2833_v5  ;;  %v1596_v40 = vadd.f32 %v1564_v53, %v1356_v7 }
 0x14e   : > { %899 = vst [vmem:[#allocation2 + $0x169] sm:$0xff] %v823_v41  ;;  %v826_v20 = vmul.f32 %v794_v37, %v2957_v58  ;;  %v1597_v60 = vadd.f32 %v1565_v31, %v1357_v57  ;;  %v1054_v28 = vmul.f32 %v2735_v8, %v3018_v62  ;;  %v1055_v56 = vmul.f32 %v2735_v8, %v3021_v50  ;;  %v3063_v31 = vld [vmem:[#allocation2 + $0x78] sm:$0xff] }
 0x14f   : > { %v824_v29 = vmul.f32 %v792_v14, %v2963_v21  ;;  %v1019_v22 = vadd.f32 %v987_v19, %v2836_v15  ;;  %v1226_v52 = vmul.f32 %v2727_v2, %v2802_v30  ;;  %v1635_v5 = vmul.f32 %v2968_v48, %v1596_v40  ;;  %v3068_v40 = vld [vmem:[#allocation2 + $0x80] sm:$0xff] }
 0x150   : > { %902 = vst [vmem:[#allocation2 + $0x189] sm:$0xff] %v826_v20  ;;  %v1636_v58 = vmul.f32 %v2968_v48, %v1597_v60  ;;  %v1086_v6 = vadd.f32 %v1054_v28, %v1018_v47  ;;  %v1227_v63 = vmul.f32 %v2727_v2, %v2815_v33  ;;  %v1294_v38 = vmul.f32 %v2744_v16, %v2795_v25 }
 0x151   : > { %900 = vst [vmem:[#allocation2 + $0x171] sm:$0xff] %v824_v29  ;;  %v1087_v21 = vadd.f32 %v1055_v56, %v1019_v22  ;;  %v1258_v15 = vadd.f32 %v1226_v52, %v2782_v4  ;;  %v1466_v23 = vmul.f32 %v2746_v17, %v2998_v45  ;;  %v1674_v34 = vadd.f32 %v2978_v35, %v1635_v5 }
 0x152   : > { %v1675_v43 = vadd.f32 %v2978_v35, %v1636_v58  ;;  %v1259_v46 = vadd.f32 %v1227_v63, %v2786_v10  ;;  %v1467_v54 = vmul.f32 %v2746_v17, %v3003_v42  ;;  %v1295_v4 = vmul.f32 %v2744_v16, %v2809_v32  ;;  %v3864_v58 = vld [vmem:[#allocation3_spill] sm:$0xff] }
 0x153   : > { %v1326_v3 = vadd.f32 %v1294_v38, %v1258_v15  ;;  %v1498_v39 = vadd.f32 %v1466_v23, %v2914_v26  ;;  %v1534_v9 = vmul.f32 %v2754_v24, %v3039_v0  ;;  %v3058_v44 = vmul.f32 0.5, %v1674_v34 }
 0x154   : > { %v2498_v12 = vpop.eup %2497  ;;  %v1738_v13 = vmul.f32 0.70710677, %v1674_v34  ;;  %v1739_v11 = vmul.f32 0.70710677, %v1675_v43  ;;  %v1535_v10 = vmul.f32 %v2754_v24, %v3044_v27  ;;  %v1327_v55 = vadd.f32 %v1295_v4, %v1259_v46 }
 0x155   : > { %v2500_v7 = vpop.eup %2499  ;;  %v1800_v57 = vadd.f32 1.0, %v2498_v12  ;;  %v1358_v41 = vadd.f32 %v1326_v3, %v1086_v6  ;;  %v1499_v37 = vadd.f32 %v1467_v54, %v2925_v36  ;;  %v1566_v26 = vadd.f32 %v1534_v9, %v1498_v39  ;;  %v3866_v3 = vld [vmem:[#allocation6_spill] sm:$0xff] }
 0x156   : > { %v1801_v53 = vadd.f32 1.0, %v2500_v7  ;;  %2501 = verf.f32 %v1738_v13  ;;  %v952_v14 = vmul.f32 %v2710_v51, %v2959_v1  ;;  %v1359_v47 = vadd.f32 %v1327_v55, %v1087_v21  ;;  %v3096_v13 = vld [vmem:[#allocation2 + $0x7a] sm:$0xff] }
 0x157   : > { %v1832_v19 = vmul.f32 %v1800_v57, %v3007_v49  ;;  %2503 = verf.f32 %v1739_v11  ;;  %v1567_v20 = vadd.f32 %v1535_v10, %v1499_v37  ;;  %v1598_v28 = vadd.f32 %v1566_v26, %v1358_v41  ;;  %v3867_v11 = vld [vmem:[#allocation4_spill] sm:$0xff]  ;;  %v3104_v26 = vld [vmem:[#allocation2 + $0x82] sm:$0xff] }
 0x158   : > { %v1833_v60 = vmul.f32 %v1801_v53, %v1705_v18  ;;  %v953_v36 = vmul.f32 %v2710_v51, %v2961_v61  ;;  %v988_v29 = vmul.f32 %v2718_v59, %v3018_v62  ;;  %v1707_v22 = vmul.f32 0.5, %v1675_v43  ;;  %v3865_v43 = vld [vmem:[#allocation5_spill] sm:$0xff] }
 0x159   : > { %v1599_v56 = vadd.f32 %v1567_v20, %v1359_v47  ;;  %v989_v1 = vmul.f32 %v2718_v59, %v3021_v50  ;;  %v1056_v49 = vmul.f32 %v2735_v8, %v3063_v31  ;;  %v1637_v5 = vmul.f32 %v2968_v48, %v1598_v28 }
 0x15a   : > { %v1864_v52 = vpack.c.bf16 %v1833_v60, %v1832_v19  ;;  %v1057_v18 = vmul.f32 %v2735_v8, %v3068_v40  ;;  %v1192_v61 = vmul.f32 %v3864_v58, %v2802_v30  ;;  %v1020_v63 = vadd.f32 %v988_v29, %v952_v14 }
 0x15b   : > { %v1638_v6 = vmul.f32 %v2968_v48, %v1599_v56  ;;  %v1193_v21 = vmul.f32 %v3864_v58, %v2815_v33  ;;  %v1228_v15 = vmul.f32 %v2727_v2, %v2795_v25  ;;  %v1676_v38 = vadd.f32 %v2978_v35, %v1637_v5  ;;  %v3112_v56 = vld [vmem:[#allocation2 + $0x90] sm:$0xff] }
 0x15c   : > { %2360 = vmatprep.mubr.bf16.mxu1 %v1864_v52  ;;  %v1021_v23 = vadd.f32 %v989_v1, %v953_v36  ;;  %v1229_v34 = vmul.f32 %v2727_v2, %v2809_v32  ;;  %v1296_v46 = vmul.f32 %v2744_v16, %v3865_v43  ;;  %v1088_v54 = vadd.f32 %v1056_v49, %v1020_v63  ;;  %v3114_v1 = vld [vmem:[#allocation2 + $0x98] sm:$0xff] }
 0x15d   : > { %v1677_v30 = vadd.f32 %v2978_v35, %v1638_v6  ;;  %v1260_v4 = vadd.f32 %v1228_v15, %v1192_v61  ;;  %v1297_v33 = vmul.f32 %v2744_v16, %v3866_v3  ;;  %v1740_v39 = vmul.f32 0.70710677, %v1676_v38 }
 0x15e   : > { %v1089_v9 = vadd.f32 %v1057_v18, %v1021_v23  ;;  %v1261_v12 = vadd.f32 %v1229_v34, %v1193_v21  ;;  %v1432_v10 = vmul.f32 %v3867_v11, %v2998_v45  ;;  %v3100_v7 = vmul.f32 0.5, %v1676_v38 }
 0x15f   : > { %v1741_v57 = vmul.f32 0.70710677, %v1677_v30  ;;  %v1328_v55 = vadd.f32 %v1296_v46, %v1260_v4  ;;  %v1433_v41 = vmul.f32 %v3867_v11, %v3003_v42  ;;  %2505 = verf.f32 %v1740_v39 }
 0x160   : > { %v2502_v37 = vpop.eup %2501  ;;  %v1329_v53 = vadd.f32 %v1297_v33, %v1261_v12  ;;  %v1468_v14 = vmul.f32 %v2746_v17, %v3039_v0  ;;  %v1469_v19 = vmul.f32 %v2746_v17, %v3044_v27  ;;  %v1536_v60 = vmul.f32 %v2754_v24, %v3096_v13 }
 0x161   : > { %v2504_v47 = vpop.eup %2503  ;;  %v1802_v45 = vadd.f32 1.0, %v2502_v37  ;;  %2507 = verf.f32 %v1741_v57  ;;  %v1360_v20 = vadd.f32 %v1328_v55, %v1088_v54  ;;  %v1537_v52 = vmul.f32 %v2754_v24, %v3104_v26  ;;  %v3133_v54 = vld [vmem:[#allocation2 + $0x99] sm:$0xff] }
 0x162   : > { %v1803_v28 = vadd.f32 1.0, %v2504_v47  ;;  %v1361_v42 = vadd.f32 %v1329_v53, %v1089_v9  ;;  %v1500_v36 = vadd.f32 %v1468_v14, %v1432_v10  ;;  %v1501_v29 = vadd.f32 %v1469_v19, %v1433_v41 }
 0x163   : > { %v1834_v49 = vmul.f32 %v1802_v45, %v3058_v44  ;;  %v954_v5 = vmul.f32 %v2710_v51, %v3018_v62  ;;  %v955_v18 = vmul.f32 %v2710_v51, %v3021_v50  ;;  %v990_v63 = vmul.f32 %v2718_v59, %v3063_v31  ;;  %v3131_v62 = vld [vmem:[#allocation2 + $0x91] sm:$0xff] }
 0x164   : > { %v1835_v61 = vmul.f32 %v1803_v28, %v1707_v22  ;;  %v1568_v6 = vadd.f32 %v1536_v60, %v1500_v36  ;;  %v991_v21 = vmul.f32 %v2718_v59, %v3068_v40  ;;  %v1709_v15 = vmul.f32 0.5, %v1677_v30 }
 0x165   : > { %v1569_v38 = vadd.f32 %v1537_v52, %v1501_v29  ;;  %v1058_v44 = vmul.f32 %v2735_v8, %v3112_v56  ;;  %v1059_v23 = vmul.f32 %v2735_v8, %v3114_v1  ;;  %v1022_v22 = vadd.f32 %v990_v63, %v954_v5  ;;  %v3157_v52 = vld [vmem:[#allocation2 + $0x92] sm:$0xff]  ;;  %v3159_v5 = vld [vmem:[#allocation2 + $0x9a] sm:$0xff] }
 0x166   : > { %v1865_v34 = vpack.c.bf16 %v1835_v61, %v1834_v49  ;;  %v1600_v50 = vadd.f32 %v1568_v6, %v1360_v20  ;;  %v1023_v46 = vadd.f32 %v991_v21, %v955_v18  ;;  %v1194_v33 = vmul.f32 %v3864_v58, %v2795_v25 }
 0x167   : > { %v1601_v4 = vadd.f32 %v1569_v38, %v1361_v42  ;;  %v1230_v30 = vmul.f32 %v2727_v2, %v3865_v43  ;;  %v1231_v39 = vmul.f32 %v2727_v2, %v3866_v3  ;;  %v1090_v12 = vadd.f32 %v1058_v44, %v1022_v22  ;;  %v3166_v44 = vld [vmem:[#allocation2 + $0xa8] sm:$0xff]  ;;  %v3172_v22 = vld [vmem:[#allocation2 + $0xb0] sm:$0xff] }
 0x168   : > { %2361 = vmatmul.mubr.bf16.vlgmr.msra.gmra.mrb[0].mxu1 %v1865_v34  ;;  %v1639_v9 = vmul.f32 %v2968_v48, %v1600_v50  ;;  %v1195_v10 = vmul.f32 %v3864_v58, %v2809_v32  ;;  %v1298_v57 = vmul.f32 %v2744_v16, %v3131_v62  ;;  %v1091_v41 = vadd.f32 %v1059_v23, %v1023_v46 }
 0x169   : > { %v1640_v55 = vmul.f32 %v2968_v48, %v1601_v4  ;;  %v1262_v25 = vadd.f32 %v1230_v30, %v1194_v33  ;;  %v1299_v37 = vmul.f32 %v2744_v16, %v3133_v54  ;;  %v2506_v53 = vpop.eup %2505  ;;  %v1434_v47 = vmul.f32 %v3867_v11, %v3039_v0 }
 0x16a   : > { %v1678_v14 = vadd.f32 %v2978_v35, %v1639_v9  ;;  %v1263_v19 = vadd.f32 %v1231_v39, %v1195_v10  ;;  %v1470_v32 = vmul.f32 %v2746_v17, %v3096_v13  ;;  %v1804_v20 = vadd.f32 1.0, %v2506_v53  ;;  %v3186_v10 = vld [vmem:[#allocation2 + $0xb1] sm:$0xff] }
 0x16b   : > { %v2508_v45 = vpop.eup %2507  ;;  %v1679_v60 = vadd.f32 %v2978_v35, %v1640_v55  ;;  %v1330_v28 = vadd.f32 %v1298_v57, %v1262_v25  ;;  %v1435_v42 = vmul.f32 %v3867_v11, %v3044_v27  ;;  %v1471_v0 = vmul.f32 %v2746_v17, %v3104_v26 }
 0x16c   : > { %v1805_v36 = vadd.f32 1.0, %v2508_v45  ;;  %v1742_v29 = vmul.f32 0.70710677, %v1678_v14  ;;  %v1331_v49 = vadd.f32 %v1299_v37, %v1263_v19  ;;  %v1836_v18 = vmul.f32 %v1804_v20, %v3100_v7 }
 0x16d   : > { %v3164_v61 = vmul.f32 0.5, %v1678_v14  ;;  %v1743_v6 = vmul.f32 0.70710677, %v1679_v60  ;;  %v1362_v63 = vadd.f32 %v1330_v28, %v1090_v12  ;;  %v1502_v27 = vadd.f32 %v1470_v32, %v1434_v47  ;;  %v3184_v12 = vld [vmem:[#allocation2 + $0xa9] sm:$0xff] }
 0x16e   : > { %v1837_v21 = vmul.f32 %v1805_v36, %v1709_v15  ;;  %2509 = verf.f32 %v1742_v29  ;;  %v1363_v38 = vadd.f32 %v1331_v49, %v1091_v41  ;;  %v1503_v23 = vadd.f32 %v1471_v0, %v1435_v42  ;;  %v3204_v28 = vld [vmem:[#allocation2 + $0xaa] sm:$0xff]  ;;  %v3206_v36 = vld [vmem:[#allocation2 + $0xb2] sm:$0xff] }
 0x16f   : > { %2511 = verf.f32 %v1743_v6  ;;  %v1538_v34 = vmul.f32 %v2754_v24, %v3157_v52  ;;  %v1539_v50 = vmul.f32 %v2754_v24, %v3159_v5  ;;  %v956_v46 = vmul.f32 %v2710_v51, %v3063_v31 }
 0x170   : > { %v1866_v7 = vpack.c.bf16 %v1837_v21, %v1836_v18  ;;  %v957_v15 = vmul.f32 %v2710_v51, %v3068_v40  ;;  %v992_v4 = vmul.f32 %v2718_v59, %v3112_v56  ;;  %v993_v39 = vmul.f32 %v2718_v59, %v3114_v1 }
 0x171   : > { %v1570_v33 = vadd.f32 %v1538_v34, %v1502_v27  ;;  %v1571_v30 = vadd.f32 %v1539_v50, %v1503_v23  ;;  %v1060_v9 = vmul.f32 %v2735_v8, %v3166_v44  ;;  %v1061_v40 = vmul.f32 %v2735_v8, %v3172_v22 }
 0x172   : > { %2364 = vmatprep.mubr.bf16.mxu1 %v1866_v7  ;;  %v1024_v31 = vadd.f32 %v992_v4, %v956_v46  ;;  %v1196_v57 = vmul.f32 %v3864_v58, %v3865_v43  ;;  %v1197_v55 = vmul.f32 %v3864_v58, %v3866_v3  ;;  %v1025_v37 = vadd.f32 %v993_v39, %v957_v15 }
 0x173   : > { %v1602_v41 = vadd.f32 %v1570_v33, %v1362_v63  ;;  %v1603_v25 = vadd.f32 %v1571_v30, %v1363_v38  ;;  %v1232_v53 = vmul.f32 %v2727_v2, %v3131_v62  ;;  %v1233_v19 = vmul.f32 %v2727_v2, %v3133_v54 }
 0x174   : > { %v1092_v14 = vadd.f32 %v1060_v9, %v1024_v31  ;;  %v1300_v47 = vmul.f32 %v2744_v16, %v3184_v12  ;;  %v1301_v32 = vmul.f32 %v2744_v16, %v3186_v10  ;;  %v1093_v45 = vadd.f32 %v1061_v40, %v1025_v37  ;;  %v3225_v40 = vld [vmem:[#allocation2 + $0xc0] sm:$0xff] }
 0x175   : > { %v1641_v43 = vmul.f32 %v2968_v48, %v1602_v41  ;;  %v1642_v3 = vmul.f32 %v2968_v48, %v1603_v25  ;;  %v1264_v20 = vadd.f32 %v1232_v53, %v1196_v57  ;;  %v1265_v42 = vadd.f32 %v1233_v19, %v1197_v55  ;;  %v3227_v57 = vld [vmem:[#allocation2 + $0xc8] sm:$0xff] }
 0x176   : > { %v1436_v29 = vmul.f32 %v3867_v11, %v3096_v13  ;;  %v1437_v49 = vmul.f32 %v3867_v11, %v3104_v26  ;;  %v1472_v0 = vmul.f32 %v2746_v17, %v3157_v52  ;;  %v1473_v21 = vmul.f32 %v2746_v17, %v3159_v5 }
 0x177   : > { %v1680_v18 = vadd.f32 %v2978_v35, %v1641_v43  ;;  %v1681_v6 = vadd.f32 %v2978_v35, %v1642_v3  ;;  %v1332_v63 = vadd.f32 %v1300_v47, %v1264_v20  ;;  %v1711_v27 = vmul.f32 0.5, %v1679_v60 }
 0x178   : > { %v2510_v38 = vpop.eup %2509  ;;  %v1333_v23 = vadd.f32 %v1301_v32, %v1265_v42  ;;  %v1504_v34 = vadd.f32 %v1472_v0, %v1436_v29  ;;  %v1540_v13 = vmul.f32 %v2754_v24, %v3204_v28  ;;  %v1541_v15 = vmul.f32 %v2754_v24, %v3206_v36  ;;  %v3244_v42 = vld [vmem:[#allocation2 + $0xc9] sm:$0xff] }
 0x179   : > { %v2512_v50 = vpop.eup %2511  ;;  %v1806_v26 = vadd.f32 1.0, %v2510_v38  ;;  %v3220_v7 = vmul.f32 0.5, %v1680_v18  ;;  %v1744_v46 = vmul.f32 0.70710677, %v1680_v18  ;;  %v1745_v33 = vmul.f32 0.70710677, %v1681_v6 }
 0x17a   : > { %v1807_v4 = vadd.f32 1.0, %v2512_v50  ;;  %v1364_v30 = vadd.f32 %v1332_v63, %v1092_v14  ;;  %v1365_v39 = vadd.f32 %v1333_v23, %v1093_v45  ;;  %v1505_v60 = vadd.f32 %v1473_v21, %v1437_v49 }
 0x17b   : > { %v1838_v9 = vmul.f32 %v1806_v26, %v3164_v61  ;;  %2513 = verf.f32 %v1744_v46  ;;  %v1572_v31 = vadd.f32 %v1540_v13, %v1504_v34  ;;  %v958_v41 = vmul.f32 %v2710_v51, %v3112_v56  ;;  %v3241_v56 = vld [vmem:[#allocation2 + $0xc1] sm:$0xff] }
 0x17c   : > { %v1839_v55 = vmul.f32 %v1807_v4, %v1711_v27  ;;  %2515 = verf.f32 %v1745_v33  ;;  %v959_v25 = vmul.f32 %v2710_v51, %v3114_v1  ;;  %v1573_v37 = vadd.f32 %v1541_v15, %v1505_v60  ;;  %v3260_v34 = vld [vmem:[#allocation2 + $0xc2] sm:$0xff]  ;;  %v3267_v33 = vld [vmem:[#allocation2 + $0xca] sm:$0xff] }
 0x17d   : > { %v1604_v53 = vadd.f32 %v1572_v31, %v1364_v30  ;;  %v994_v61 = vmul.f32 %v2718_v59, %v3166_v44  ;;  %v995_v14 = vmul.f32 %v2718_v59, %v3172_v22  ;;  %v1713_v47 = vmul.f32 0.5, %v1681_v6 }
 0x17e   : > { %v1867_v19 = vpack.c.bf16 %v1839_v55, %v1838_v9  ;;  %v1062_v32 = vmul.f32 %v2735_v8, %v3225_v40  ;;  %v1063_v43 = vmul.f32 %v2735_v8, %v3227_v57  ;;  %v1605_v3 = vadd.f32 %v1573_v37, %v1365_v39 }
 0x17f   : > { %v1643_v1 = vmul.f32 %v2968_v48, %v1604_v53  ;;  %v1026_v45 = vadd.f32 %v994_v61, %v958_v41  ;;  %v1027_v20 = vadd.f32 %v995_v14, %v959_v25  ;;  %v1198_v29 = vmul.f32 %v3864_v58, %v3131_v62 }
 0x180   : > { %2365 = vmatmul.mubr.bf16.gmra.mrb[4].mxu1 %v1867_v19  ;;  %v1199_v49 = vmul.f32 %v3864_v58, %v3133_v54  ;;  %v1234_v0 = vmul.f32 %v2727_v2, %v3184_v12  ;;  %v1235_v18 = vmul.f32 %v2727_v2, %v3186_v10  ;;  %v1644_v6 = vmul.f32 %v2968_v48, %v1605_v3 }
 0x181   : > { %v1682_v63 = vadd.f32 %v2978_v35, %v1643_v1  ;;  %v1094_v21 = vadd.f32 %v1062_v32, %v1026_v45  ;;  %v1302_v38 = vmul.f32 %v2744_v16, %v3241_v56  ;;  %v1095_v27 = vadd.f32 %v1063_v43, %v1027_v20  ;;  %v3279_v32 = vld [vmem:[#allocation2 + $0xd8] sm:$0xff]  ;;  %v3281_v43 = vld [vmem:[#allocation2 + $0xe0] sm:$0xff] }
 0x182   : > { %v1266_v23 = vadd.f32 %v1234_v0, %v1198_v29  ;;  %v1267_v62 = vadd.f32 %v1235_v18, %v1199_v49  ;;  %v1303_v54 = vmul.f32 %v2744_v16, %v3244_v42  ;;  %v1683_v13 = vadd.f32 %v2978_v35, %v1644_v6 }
 0x183   : > { %v3263_v50 = vmul.f32 0.5, %v1682_v63  ;;  %v1746_v26 = vmul.f32 0.70710677, %v1682_v63  ;;  %v1438_v46 = vmul.f32 %v3867_v11, %v3157_v52  ;;  %v1474_v30 = vmul.f32 %v2746_v17, %v3204_v28  ;;  %v3296_v63 = vld [vmem:[#allocation2 + $0xd9] sm:$0xff] }
 0x184   : > { %v1334_v15 = vadd.f32 %v1302_v38, %v1266_v23  ;;  %v1335_v4 = vadd.f32 %v1303_v54, %v1267_v62  ;;  %v1475_v39 = vmul.f32 %v2746_v17, %v3206_v36  ;;  %v1747_v60 = vmul.f32 0.70710677, %v1683_v13 }
 0x185   : > { %v2514_v9 = vpop.eup %2513  ;;  %2517 = verf.f32 %v1746_v26  ;;  %v1439_v31 = vmul.f32 %v3867_v11, %v3159_v5  ;;  %v1542_v55 = vmul.f32 %v2754_v24, %v3260_v34  ;;  %v1506_v53 = vadd.f32 %v1474_v30, %v1438_v46 }
 0x186   : > { %v2516_v52 = vpop.eup %2515  ;;  %v1808_v41 = vadd.f32 1.0, %v2514_v9  ;;  %v1366_v25 = vadd.f32 %v1334_v15, %v1094_v21  ;;  %v1367_v37 = vadd.f32 %v1335_v4, %v1095_v27  ;;  %2519 = verf.f32 %v1747_v60  ;;  %v3300_v27 = vld [vmem:[#allocation2 + $0xe1] sm:$0xff] }
 0x187   : > { %v1809_v61 = vadd.f32 1.0, %v2516_v52  ;;  %v1507_v14 = vadd.f32 %v1475_v39, %v1439_v31  ;;  %v1543_v19 = vmul.f32 %v2754_v24, %v3267_v33  ;;  %v1574_v3 = vadd.f32 %v1542_v55, %v1506_v53 }
 0x188   : > { %v1840_v5 = vmul.f32 %v1808_v41, %v3220_v7  ;;  %v960_v1 = vmul.f32 %v2710_v51, %v3166_v44  ;;  %v961_v45 = vmul.f32 %v2710_v51, %v3172_v22  ;;  %v996_v49 = vmul.f32 %v2718_v59, %v3225_v40 }
 0x189   : > { %v1841_v20 = vmul.f32 %v1809_v61, %v1713_v47  ;;  %v1575_v29 = vadd.f32 %v1543_v19, %v1507_v14  ;;  %v997_v0 = vmul.f32 %v2718_v59, %v3227_v57  ;;  %v1606_v18 = vadd.f32 %v1574_v3, %v1366_v25 }
 0x18a   : > { %v1064_v6 = vmul.f32 %v2735_v8, %v3279_v32  ;;  %v1065_v7 = vmul.f32 %v2735_v8, %v3281_v43  ;;  %v1200_v44 = vmul.f32 %v3864_v58, %v3184_v12  ;;  %v1028_v21 = vadd.f32 %v996_v49, %v960_v1  ;;  %v3327_v1 = vld [vmem:[#allocation2 + $0xda] sm:$0xff] }
 0x18b   : > { %v1868_v22 = vpack.c.bf16 %v1841_v20, %v1840_v5  ;;  %v1607_v47 = vadd.f32 %v1575_v29, %v1367_v37  ;;  %v1029_v38 = vadd.f32 %v997_v0, %v961_v45  ;;  %v1645_v23 = vmul.f32 %v2968_v48, %v1606_v18  ;;  %v3329_v45 = vld [vmem:[#allocation2 + $0xe2] sm:$0xff]  ;;  %v3334_v29 = vld [vmem:[#allocation2 + $0xf0] sm:$0xff] }
 0x18c   : > { %v1201_v62 = vmul.f32 %v3864_v58, %v3186_v10  ;;  %v1236_v54 = vmul.f32 %v2727_v2, %v3241_v56  ;;  %v1237_v26 = vmul.f32 %v2727_v2, %v3244_v42  ;;  %v1096_v46 = vadd.f32 %v1064_v6, %v1028_v21  ;;  %v3336_v6 = vld [vmem:[#allocation2 + $0xf8] sm:$0xff] }
 0x18d   : > { %2368 = vmatprep.mubr.bf16.mxu1 %v1868_v22  ;;  %v1646_v12 = vmul.f32 %v2968_v48, %v1607_v47  ;;  %v1097_v15 = vadd.f32 %v1065_v7, %v1029_v38  ;;  %v1304_v4 = vmul.f32 %v2744_v16, %v3296_v63  ;;  %v1684_v30 = vadd.f32 %v2978_v35, %v1645_v23 }
 0x18e   : > { %v1268_v39 = vadd.f32 %v1236_v54, %v1200_v44  ;;  %v1269_v9 = vadd.f32 %v1237_v26, %v1201_v62  ;;  %v1305_v10 = vmul.f32 %v2744_v16, %v3300_v27  ;;  %v1440_v55 = vmul.f32 %v3867_v11, %v3204_v28 }
 0x18f   : > { %v2518_v60 = vpop.eup %2517  ;;  %v3316_v31 = vadd.f32 %v2978_v35, %v1646_v12  ;;  %v1441_v52 = vmul.f32 %v3867_v11, %v3206_v36  ;;  %v1476_v41 = vmul.f32 %v2746_v17, %v3260_v34  ;;  %v1715_v25 = vmul.f32 0.5, %v1683_v13 }
 0x190   : > { %v1810_v37 = vadd.f32 1.0, %v2518_v60  ;;  %v1748_v53 = vmul.f32 0.70710677, %v1684_v30  ;;  %v1336_v61 = vadd.f32 %v1304_v4, %v1268_v39  ;;  %v2520_v14 = vpop.eup %2519  ;;  %v3324_v19 = vmul.f32 0.5, %v1684_v30 }
 0x191   : > { %v1749_v5 = vmul.f32 0.70710677, %v3316_v31  ;;  %v1337_v3 = vadd.f32 %v1305_v10, %v1269_v9  ;;  %v1477_v28 = vmul.f32 %v2746_v17, %v3267_v33  ;;  %v1811_v36 = vadd.f32 1.0, %v2520_v14 }
 0x192   : > { %v1842_v20 = vmul.f32 %v1810_v37, %v3263_v50  ;;  %2521 = verf.f32 %v1748_v53  ;;  %v1368_v13 = vadd.f32 %v1336_v61, %v1096_v46  ;;  %v1508_v0 = vadd.f32 %v1476_v41, %v1440_v55  ;;  %v3354_v46 = vld [vmem:[#allocation2 + $0xf1] sm:$0xff] }
 0x193   : > { %2523 = verf.f32 %v1749_v5  ;;  %v1369_v49 = vadd.f32 %v1337_v3, %v1097_v15  ;;  %v1509_v18 = vadd.f32 %v1477_v28, %v1441_v52  ;;  %v1843_v7 = vmul.f32 %v1811_v36, %v1715_v25  ;;  %v3372_v61 = vld [vmem:[#allocation2 + $0xf2] sm:$0xff] }
 0x194   : > { %v1544_v44 = vmul.f32 %v2754_v24, %v3327_v1  ;;  %v1545_v22 = vmul.f32 %v2754_v24, %v3329_v45  ;;  %v962_v50 = vmul.f32 %v2710_v51, %v3225_v40  ;;  %v963_v47 = vmul.f32 %v2710_v51, %v3227_v57  ;;  %v3356_v40 = vld [vmem:[#allocation2 + $0xf9] sm:$0xff] }
 0x195   : > { %v998_v21 = vmul.f32 %v2718_v59, %v3279_v32  ;;  %v999_v38 = vmul.f32 %v2718_v59, %v3281_v43  ;;  %v1066_v23 = vmul.f32 %v2735_v8, %v3334_v29  ;;  %v1869_v62 = vpack.c.bf16 %v1843_v7, %v1842_v20 }
 0x196   : > { %v1576_v54 = vadd.f32 %v1544_v44, %v1508_v0  ;;  %v1577_v26 = vadd.f32 %v1545_v22, %v1509_v18  ;;  %v1067_v12 = vmul.f32 %v2735_v8, %v3336_v6  ;;  %v1202_v4 = vmul.f32 %v3864_v58, %v3241_v56  ;;  %v3385_v44 = vld [vmem:[#allocation2 + $0xfa] sm:$0xff] }
 0x197   : > { %v1030_v57 = vadd.f32 %v998_v21, %v962_v50  ;;  %v1031_v15 = vadd.f32 %v999_v38, %v963_v47  ;;  %v1203_v30 = vmul.f32 %v3864_v58, %v3244_v42  ;;  %2369 = vmatmul.mubr.bf16.gmra.mrb[8].mxu1 %v1869_v62  ;;  %v1238_v10 = vmul.f32 %v2727_v2, %v3296_v63 }
 0x198   : > { %v1608_v39 = vadd.f32 %v1576_v54, %v1368_v13  ;;  %v1609_v9 = vadd.f32 %v1577_v26, %v1369_v49  ;;  %v1239_v60 = vmul.f32 %v2727_v2, %v3300_v27  ;;  %v1306_v41 = vmul.f32 %v2744_v16, %v3354_v46 }
 0x199   : > { %v1098_v55 = vadd.f32 %v1066_v23, %v1030_v57  ;;  %v1099_v52 = vadd.f32 %v1067_v12, %v1031_v15  ;;  %v1307_v56 = vmul.f32 %v2744_v16, %v3356_v40  ;;  %v1270_v37 = vadd.f32 %v1238_v10, %v1202_v4  ;;  %v3394_v15 = vld [vmem:[#allocation2 + $0x108] sm:$0xff]  ;;  %v3396_v4 = vld [vmem:[#allocation2 + $0x110] sm:$0xff] }
 0x19a   : > { %v1647_v25 = vmul.f32 %v2968_v48, %v1608_v39  ;;  %v1648_v42 = vmul.f32 %v2968_v48, %v1609_v9  ;;  %v1271_v53 = vadd.f32 %v1239_v60, %v1203_v30  ;;  %v1442_v14 = vmul.f32 %v3867_v11, %v3260_v34 }
 0x19b   : > { %v1443_v5 = vmul.f32 %v3867_v11, %v3267_v33  ;;  %v1478_v3 = vmul.f32 %v2746_v17, %v3327_v1  ;;  %v1479_v28 = vmul.f32 %v2746_v17, %v3329_v45  ;;  %v1338_v49 = vadd.f32 %v1306_v41, %v1270_v37 }
 0x19c   : > { %v2522_v36 = vpop.eup %2521  ;;  %v1686_v20 = vadd.f32 %v2978_v35, %v1647_v25  ;;  %v1687_v13 = vadd.f32 %v2978_v35, %v1648_v42  ;;  %v1339_v0 = vadd.f32 %v1307_v56, %v1271_v53  ;;  %v1717_v7 = vmul.f32 0.5, %v3316_v31  ;;  %v3412_v25 = vld [vmem:[#allocation2 + $0x111] sm:$0xff] }
 0x19d   : > { %v2524_v18 = vpop.eup %2523  ;;  %v1812_v34 = vadd.f32 1.0, %v2522_v36  ;;  %v1510_v33 = vadd.f32 %v1478_v3, %v1442_v14  ;;  %v1511_v22 = vadd.f32 %v1479_v28, %v1443_v5  ;;  %v1546_v38 = vmul.f32 %v2754_v24, %v3372_v61 }
 0x19e   : > { %v1813_v50 = vadd.f32 1.0, %v2524_v18  ;;  %v3387_v47 = vmul.f32 0.5, %v1686_v20  ;;  %v1750_v21 = vmul.f32 0.70710677, %v1686_v20  ;;  %v1751_v62 = vmul.f32 0.70710677, %v1687_v13 }
 0x19f   : > { %v1844_v23 = vmul.f32 %v1812_v34, %v3324_v19  ;;  %v1370_v54 = vadd.f32 %v1338_v49, %v1098_v55  ;;  %v1371_v26 = vadd.f32 %v1339_v0, %v1099_v52  ;;  %v1547_v31 = vmul.f32 %v2754_v24, %v3385_v44  ;;  %v3406_v52 = vld [vmem:[#allocation2 + $0x109] sm:$0xff] }
 0x1a0   : > { %v1845_v12 = vmul.f32 %v1813_v50, %v1717_v7  ;;  %2525 = verf.f32 %v1750_v21  ;;  %v1578_v57 = vadd.f32 %v1546_v38, %v1510_v33  ;;  %v964_v30 = vmul.f32 %v2710_v51, %v3279_v32  ;;  %v3429_v18 = vld [vmem:[#allocation2 + $0x10a] sm:$0xff] }
 0x1a1   : > { %2527 = verf.f32 %v1751_v62  ;;  %v965_v19 = vmul.f32 %v2710_v51, %v3281_v43  ;;  %v1000_v39 = vmul.f32 %v2718_v59, %v3334_v29  ;;  %v1579_v10 = vadd.f32 %v1547_v31, %v1511_v22  ;;  %v3438_v62 = vld [vmem:[#allocation2 + $0x112] sm:$0xff] }
 0x1a2   : > { %v1870_v9 = vpack.c.bf16 %v1845_v12, %v1844_v23  ;;  %v1610_v60 = vadd.f32 %v1578_v57, %v1370_v54  ;;  %v1001_v55 = vmul.f32 %v2718_v59, %v3336_v6  ;;  %v1068_v56 = vmul.f32 %v2735_v8, %v3394_v15 }
 0x1a3   : > { %v1032_v41 = vadd.f32 %v1000_v39, %v964_v30  ;;  %v1069_v32 = vmul.f32 %v2735_v8, %v3396_v4  ;;  %v1204_v43 = vmul.f32 %v3864_v58, %v3296_v63  ;;  %v1611_v42 = vadd.f32 %v1579_v10, %v1371_v26 }
 0x1a4   : > { %2372 = vmatprep.mubr.bf16.mxu1 %v1870_v9  ;;  %v1649_v37 = vmul.f32 %v2968_v48, %v1610_v60  ;;  %v1033_v53 = vadd.f32 %v1001_v55, %v965_v19  ;;  %v1205_v14 = vmul.f32 %v3864_v58, %v3300_v27  ;;  %v1240_v3 = vmul.f32 %v2727_v2, %v3354_v46  ;;  %v3448_v60 = vld [vmem:[#allocation2 + $0x120] sm:$0xff]  ;;  %v3450_v55 = vld [vmem:[#allocation2 + $0x128] sm:$0xff] }
 0x1a5   : > { %v1100_v5 = vadd.f32 %v1068_v56, %v1032_v41  ;;  %v1241_v28 = vmul.f32 %v2727_v2, %v3356_v40  ;;  %v1308_v36 = vmul.f32 %v2744_v16, %v3406_v52  ;;  %v1650_v63 = vmul.f32 %v2968_v48, %v1611_v42 }
 0x1a6   : > { %v1688_v20 = vadd.f32 %v2978_v35, %v1649_v37  ;;  %v1101_v49 = vadd.f32 %v1069_v32, %v1033_v53  ;;  %v1309_v0 = vmul.f32 %v2744_v16, %v3412_v25  ;;  %v1272_v27 = vadd.f32 %v1240_v3, %v1204_v43 }
 0x1a7   : > { %v1273_v7 = vadd.f32 %v1241_v28, %v1205_v14  ;;  %v1444_v34 = vmul.f32 %v3867_v11, %v3327_v1  ;;  %v1445_v33 = vmul.f32 %v3867_v11, %v3329_v45  ;;  %v1719_v22 = vmul.f32 0.5, %v1687_v13 }
 0x1a8   : > { %v1689_v50 = vadd.f32 %v2978_v35, %v1650_v63  ;;  %v1752_v48 = vmul.f32 0.70710677, %v1688_v20  ;;  %v1480_v21 = vmul.f32 %v2746_v17, %v3372_v61  ;;  %v1340_v38 = vadd.f32 %v1308_v36, %v1272_v27 }
 0x1a9   : > { %v1341_v23 = vadd.f32 %v1309_v0, %v1273_v7  ;;  %v1481_v54 = vmul.f32 %v2746_v17, %v3385_v44  ;;  %v1548_v1 = vmul.f32 %v2754_v24, %v3429_v18  ;;  %v3444_v12 = vmul.f32 0.5, %v1688_v20  ;;  %v3473_v0 = vld [vmem:[#allocation2 + $0x129] sm:$0xff] }
 0x1aa   : > { %v2526_v26 = vpop.eup %2525  ;;  %v1753_v45 = vmul.f32 0.70710677, %v1689_v50  ;;  %2529 = verf.f32 %v1752_v48  ;;  %v1512_v35 = vadd.f32 %v1480_v21, %v1444_v34  ;;  %v1372_v57 = vadd.f32 %v1340_v38, %v1100_v5 }
 0x1ab   : > { %v2528_v13 = vpop.eup %2527  ;;  %v1814_v31 = vadd.f32 1.0, %v2526_v26  ;;  %v1373_v30 = vadd.f32 %v1341_v23, %v1101_v49  ;;  %v1513_v19 = vadd.f32 %v1481_v54, %v1445_v33  ;;  %v1549_v9 = vmul.f32 %v2754_v24, %v3438_v62  ;;  %v3471_v49 = vld [vmem:[#allocation2 + $0x121] sm:$0xff] }
 0x1ac   : > { %v1815_v39 = vadd.f32 1.0, %v2528_v13  ;;  %2531 = verf.f32 %v1753_v45  ;;  %v1580_v10 = vadd.f32 %v1548_v1, %v1512_v35  ;;  %v966_v56 = vmul.f32 %v2710_v51, %v3334_v29 }
 0x1ad   : > { %v1846_v41 = vmul.f32 %v1814_v31, %v3387_v47  ;;  %v967_v32 = vmul.f32 %v2710_v51, %v3336_v6  ;;  %v1002_v43 = vmul.f32 %v2718_v59, %v3394_v15  ;;  %v1581_v37 = vadd.f32 %v1549_v9, %v1513_v19  ;;  %v3468_v6 = vld [vmem:[%s3847_s4] ss:$0 sm:$0xff]  ;;  %v3501_v19 = vld [vmem:[#allocation2 + $0x122] sm:$0xff] }
 0x1ae   : > { %v1847_v42 = vmul.f32 %v1815_v39, %v1719_v22  ;;  %v1612_v53 = vadd.f32 %v1580_v10, %v1372_v57  ;;  %v1003_v14 = vmul.f32 %v2718_v59, %v3396_v4  ;;  %v1721_v5 = vmul.f32 0.5, %v1689_v50  ;;  %v3487_v50 = vld [vmem:[%s3848_s5] ss:$0 sm:$0xff] }
 0x1af   : > { %v1034_v3 = vadd.f32 %v1002_v43, %v966_v56  ;;  %v1070_v47 = vmul.f32 %v2735_v8, %v3448_v60  ;;  %v1071_v29 = vmul.f32 %v2735_v8, %v3450_v55  ;;  %v1613_v36 = vadd.f32 %v1581_v37, %v1373_v30 }
 0x1b0   : > { %v1871_v28 = vpack.c.bf16 %v1847_v42, %v1846_v41  ;;  %v1651_v63 = vmul.f32 %v3468_v6, %v1612_v53  ;;  %v1035_v20 = vadd.f32 %v1003_v14, %v967_v32  ;;  %v1206_v27 = vmul.f32 %v3864_v58, %v3354_v46  ;;  %v3506_v41 = vld [vmem:[#allocation2 + $0x12a] sm:$0xff]  ;;  %v3513_v53 = vld [vmem:[#allocation2 + $0x138] sm:$0xff] }
 0x1b1   : > { %v1207_v7 = vmul.f32 %v3864_v58, %v3356_v40  ;;  %v1242_v34 = vmul.f32 %v2727_v2, %v3406_v52  ;;  %v1243_v33 = vmul.f32 %v2727_v2, %v3412_v25  ;;  %v1652_v22 = vmul.f32 %v3468_v6, %v1613_v36 }
 0x1b2   : > { %2373 = vmatmul.mubr.bf16.gmra.mrb[12].mxu1 %v1871_v28  ;;  %v1690_v48 = vadd.f32 %v3487_v50, %v1651_v63  ;;  %v1102_v46 = vadd.f32 %v1070_v47, %v1034_v3  ;;  %v1103_v21 = vadd.f32 %v1071_v29, %v1035_v20  ;;  %v1310_v23 = vmul.f32 %v2744_v16, %v3471_v49  ;;  %v3517_v29 = vld [vmem:[#allocation2 + $0x140] sm:$0xff] }
 0x1b3   : > { %v1274_v38 = vadd.f32 %v1242_v34, %v1206_v27  ;;  %v1275_v40 = vadd.f32 %v1243_v33, %v1207_v7  ;;  %v1311_v54 = vmul.f32 %v2744_v16, %v3473_v0  ;;  %v3495_v26 = vadd.f32 %v3487_v50, %v1652_v22  ;;  %v3535_v22 = vld [vmem:[#allocation2 + $0x141] sm:$0xff] }
 0x1b4   : > { %v2530_v1 = vpop.eup %2529  ;;  %v3497_v45 = vmul.f32 0.5, %v1690_v48  ;;  %v1754_v35 = vmul.f32 0.70710677, %v1690_v48  ;;  %v1446_v13 = vmul.f32 %v3867_v11, %v3372_v61  ;;  %v1482_v39 = vmul.f32 %v2746_v17, %v3429_v18 }
 0x1b5   : > { %v1816_v31 = vadd.f32 1.0, %v2530_v1  ;;  %v1342_v57 = vadd.f32 %v1310_v23, %v1274_v38  ;;  %v1343_v30 = vadd.f32 %v1311_v54, %v1275_v40  ;;  %v1755_v10 = vmul.f32 0.70710677, %v3495_v26 }
 0x1b6   : > { %v2532_v9 = vpop.eup %2531  ;;  %2533 = verf.f32 %v1754_v35  ;;  %v1447_v56 = vmul.f32 %v3867_v11, %v3385_v44  ;;  %v1483_v61 = vmul.f32 %v2746_v17, %v3438_v62  ;;  %v1514_v14 = vadd.f32 %v1482_v39, %v1446_v13 }
 0x1b7   : > { %v1817_v32 = vadd.f32 1.0, %v2532_v9  ;;  %v1848_v43 = vmul.f32 %v1816_v31, %v3444_v12  ;;  %v1374_v42 = vadd.f32 %v1342_v57, %v1102_v46  ;;  %v1375_v37 = vadd.f32 %v1343_v30, %v1103_v21 }
 0x1b8   : > { %2535 = verf.f32 %v1755_v10  ;;  %v1515_v3 = vadd.f32 %v1483_v61, %v1447_v56  ;;  %v1550_v47 = vmul.f32 %v2754_v24, %v3501_v19  ;;  %v1551_v44 = vmul.f32 %v2754_v24, %v3506_v41 }
 0x1b9   : > { %v1849_v28 = vmul.f32 %v1817_v32, %v1721_v5  ;;  %v968_v36 = vmul.f32 %v2710_v51, %v3394_v15  ;;  %v969_v12 = vmul.f32 %v2710_v51, %v3396_v4  ;;  %v1004_v20 = vmul.f32 %v2718_v59, %v3448_v60  ;;  %v3531_v5 = vld [vmem:[#allocation2 + $0x139] sm:$0xff] }
 0x1ba   : > { %v1582_v63 = vadd.f32 %v1550_v47, %v1514_v14  ;;  %v1005_v27 = vmul.f32 %v2718_v59, %v3450_v55  ;;  %v1072_v7 = vmul.f32 %v2735_v8, %v3513_v53  ;;  %v1583_v33 = vadd.f32 %v1551_v44, %v1515_v3  ;;  %v3561_v3 = vld [vmem:[#allocation2 + $0x13a] sm:$0xff]  ;;  %v3564_v44 = vld [vmem:[#allocation2 + $0x142] sm:$0xff] }
 0x1bb   : > { %v1872_v34 = vpack.c.bf16 %v1849_v28, %v1848_v43  ;;  %v1073_v15 = vmul.f32 %v2735_v8, %v3517_v29  ;;  %v1208_v4 = vmul.f32 %v3864_v58, %v3406_v52  ;;  %v1036_v46 = vadd.f32 %v1004_v20, %v968_v36 }
 0x1bc   : > { %v1614_v48 = vadd.f32 %v1582_v63, %v1374_v42  ;;  %v1037_v21 = vadd.f32 %v1005_v27, %v969_v12  ;;  %v1209_v38 = vmul.f32 %v3864_v58, %v3412_v25  ;;  %v1615_v40 = vadd.f32 %v1583_v33, %v1375_v37  ;;  %v3569_v33 = vld [vmem:[#allocation2 + $0x150] sm:$0xff] }
 0x1bd   : > { %2376 = vmatprep.mubr.bf16.mxu1 %v1872_v34  ;;  %v1244_v23 = vmul.f32 %v2727_v2, %v3471_v49  ;;  %v1245_v54 = vmul.f32 %v2727_v2, %v3473_v0  ;;  %v1312_v1 = vmul.f32 %v2744_v16, %v3531_v5  ;;  %v1104_v52 = vadd.f32 %v1072_v7, %v1036_v46 }
 0x1be   : > { %v1653_v35 = vmul.f32 %v3468_v6, %v1614_v48  ;;  %v1105_v13 = vadd.f32 %v1073_v15, %v1037_v21  ;;  %v1313_v31 = vmul.f32 %v2744_v16, %v3535_v22  ;;  %v1654_v25 = vmul.f32 %v3468_v6, %v1615_v40 }
 0x1bf   : > { %v1276_v57 = vadd.f32 %v1244_v23, %v1208_v4  ;;  %v1277_v30 = vadd.f32 %v1245_v54, %v1209_v38  ;;  %v1448_v39 = vmul.f32 %v3867_v11, %v3429_v18  ;;  %v1449_v56 = vmul.f32 %v3867_v11, %v3438_v62  ;;  %v3581_v54 = vld [vmem:[#allocation2 + $0x158] sm:$0xff] }
 0x1c0   : > { %v2534_v9 = vpop.eup %2533  ;;  %v1692_v10 = vadd.f32 %v3487_v50, %v1653_v35  ;;  %v1484_v61 = vmul.f32 %v2746_v17, %v3501_v19  ;;  %v1485_v32 = vmul.f32 %v2746_v17, %v3506_v41  ;;  %v1693_v42 = vadd.f32 %v3487_v50, %v1654_v25  ;;  %v3585_v35 = vld [vmem:[#allocation2 + $0x151] sm:$0xff] }
 0x1c1   : > { %v1818_v43 = vadd.f32 1.0, %v2534_v9  ;;  %v1344_v37 = vadd.f32 %v1312_v1, %v1276_v57  ;;  %v1345_v14 = vadd.f32 %v1313_v31, %v1277_v30  ;;  %v1723_v47 = vmul.f32 0.5, %v3495_v26 }
 0x1c2   : > { %v2536_v18 = vpop.eup %2535  ;;  %v1756_v28 = vmul.f32 0.70710677, %v1692_v10  ;;  %v1516_v62 = vadd.f32 %v1484_v61, %v1448_v39  ;;  %v1757_v63 = vmul.f32 0.70710677, %v1693_v42  ;;  %v1517_v20 = vadd.f32 %v1485_v32, %v1449_v56 }
 0x1c3   : > { %v1819_v36 = vadd.f32 1.0, %v2536_v18  ;;  %v1850_v12 = vmul.f32 %v1818_v43, %v3497_v45  ;;  %v1376_v27 = vadd.f32 %v1344_v37, %v1104_v52  ;;  %v1377_v7 = vadd.f32 %v1345_v14, %v1105_v13  ;;  %v3606_v18 = vld [vmem:[#allocation2 + $0x152] sm:$0xff] }
 0x1c4   : > { %2537 = verf.f32 %v1756_v28  ;;  %v1552_v34 = vmul.f32 %v2754_v24, %v3561_v3  ;;  %v1553_v26 = vmul.f32 %v2754_v24, %v3564_v44  ;;  %v970_v4 = vmul.f32 %v2710_v51, %v3448_v60 }
 0x1c5   : > { %v1851_v15 = vmul.f32 %v1819_v36, %v1723_v47  ;;  %2539 = verf.f32 %v1757_v63  ;;  %v971_v45 = vmul.f32 %v2710_v51, %v3450_v55  ;;  %v1006_v46 = vmul.f32 %v2718_v59, %v3513_v53  ;;  %v3587_v55 = vld [vmem:[#allocation2 + $0x159] sm:$0xff] }
 0x1c6   : > { %v1584_v48 = vadd.f32 %v1552_v34, %v1516_v62  ;;  %v1007_v21 = vmul.f32 %v2718_v59, %v3517_v29  ;;  %v1724_v40 = vmul.f32 0.5, %v1692_v10  ;;  %v1585_v23 = vadd.f32 %v1553_v26, %v1517_v20  ;;  %v3617_v34 = vld [vmem:[#allocation2 + $0x15a] sm:$0xff] }
 0x1c7   : > { %v1873_v38 = vpack.c.bf16 %v1851_v15, %v1850_v12  ;;  %v1074_v1 = vmul.f32 %v2735_v8, %v3569_v33  ;;  %v1038_v52 = vadd.f32 %v1006_v46, %v970_v4  ;;  %v1210_v31 = vmul.f32 %v3864_v58, %v3471_v49 }
 0x1c8   : > { %v1616_v60 = vadd.f32 %v1584_v48, %v1376_v27  ;;  %v1039_v13 = vadd.f32 %v1007_v21, %v971_v45  ;;  %v1617_v25 = vadd.f32 %v1585_v23, %v1377_v7  ;;  %v1211_v57 = vmul.f32 %v3864_v58, %v3473_v0 }
 0x1c9   : > { %2377 = vmatmul.mubr.bf16.gmra.mrb[16].mxu1 %v1873_v38  ;;  %v1246_v30 = vmul.f32 %v2727_v2, %v3531_v5  ;;  %v1247_v39 = vmul.f32 %v2727_v2, %v3535_v22  ;;  %v1075_v10 = vmul.f32 %v2735_v8, %v3581_v54  ;;  %v1106_v56 = vadd.f32 %v1074_v1, %v1038_v52  ;;  %v3628_v52 = vld [vmem:[#allocation2 + $0x170] sm:$0xff] }
 0x1ca   : > { %v1655_v9 = vmul.f32 %v3468_v6, %v1616_v60  ;;  %v1314_v49 = vmul.f32 %v2744_v16, %v3585_v35  ;;  %v1656_v61 = vmul.f32 %v3468_v6, %v1617_v25  ;;  %v1315_v0 = vmul.f32 %v2744_v16, %v3587_v55 }
 0x1cb   : > { %v1278_v32 = vadd.f32 %v1246_v30, %v1210_v31  ;;  %v1279_v43 = vadd.f32 %v1247_v39, %v1211_v57  ;;  %v1107_v14 = vadd.f32 %v1075_v10, %v1039_v13  ;;  %v1450_v47 = vmul.f32 %v3867_v11, %v3501_v19  ;;  %v3640_v10 = vld [vmem:[#allocation2 + $0x169] sm:$0xff] }
 0x1cc   : > { %v1694_v37 = vadd.f32 %v3487_v50, %v1655_v9  ;;  %v1486_v28 = vmul.f32 %v2746_v17, %v3561_v3  ;;  %v3613_v62 = vadd.f32 %v3487_v50, %v1656_v61  ;;  %v1487_v63 = vmul.f32 %v2746_v17, %v3564_v44  ;;  %v3644_v61 = vld [vmem:[#allocation2 + $0x171] sm:$0xff] }
 0x1cd   : > { %v1346_v36 = vadd.f32 %v1314_v49, %v1278_v32  ;;  %v1347_v12 = vadd.f32 %v1315_v0, %v1279_v43  ;;  %v1725_v27 = vmul.f32 0.5, %v1693_v42  ;;  %v1451_v15 = vmul.f32 %v3867_v11, %v3506_v41  ;;  %v3624_v42 = vld [vmem:[#allocation2 + $0x168] sm:$0xff] }
 0x1ce   : > { %v2538_v20 = vpop.eup %2537  ;;  %v1758_v7 = vmul.f32 0.70710677, %v1694_v37  ;;  %v1518_v19 = vadd.f32 %v1486_v28, %v1450_v47  ;;  %v1759_v48 = vmul.f32 0.70710677, %v3613_v62  ;;  %v1554_v46 = vmul.f32 %v2754_v24, %v3606_v18 }
 0x1cf   : > { %v2540_v26 = vpop.eup %2539  ;;  %v1820_v4 = vadd.f32 1.0, %v2538_v20  ;;  %v1378_v45 = vadd.f32 %v1346_v36, %v1106_v56  ;;  %v1379_v38 = vadd.f32 %v1347_v12, %v1107_v14  ;;  %v1519_v23 = vadd.f32 %v1487_v63, %v1451_v15 }
 0x1d0   : > { %v1821_v21 = vadd.f32 1.0, %v2540_v26  ;;  %2541 = verf.f32 %v1758_v7  ;;  %v1555_v41 = vmul.f32 %v2754_v24, %v3617_v34  ;;  %v1586_v60 = vadd.f32 %v1554_v46, %v1518_v19 }
 0x1d1   : > { %v1852_v1 = vmul.f32 %v1820_v4, %v1724_v40  ;;  %2543 = verf.f32 %v1759_v48  ;;  %v972_v31 = vmul.f32 %v2710_v51, %v3513_v53  ;;  %v973_v25 = vmul.f32 %v2710_v51, %v3517_v29 }
 0x1d2   : > { %v1853_v13 = vmul.f32 %v1821_v21, %v1725_v27  ;;  %v1008_v57 = vmul.f32 %v2718_v59, %v3569_v33  ;;  %v1587_v30 = vadd.f32 %v1555_v41, %v1519_v23  ;;  %v1618_v39 = vadd.f32 %v1586_v60, %v1378_v45  ;;  %v3670_v23 = vld [vmem:[#allocation2 + $0x172] sm:$0xff] }
 0x1d3   : > { %v1009_v40 = vmul.f32 %v2718_v59, %v3581_v54  ;;  %v1076_v9 = vmul.f32 %v2735_v8, %v3624_v42  ;;  %v1726_v49 = vmul.f32 0.5, %v1694_v37  ;;  %v1077_v53 = vmul.f32 %v2735_v8, %v3628_v52 }
 0x1d4   : > { %v1874_v56 = vpack.c.bf16 %v1853_v13, %v1852_v1  ;;  %v1212_v29 = vmul.f32 %v3864_v58, %v3531_v5  ;;  %v1619_v32 = vadd.f32 %v1587_v30, %v1379_v38  ;;  %v1657_v43 = vmul.f32 %v3468_v6, %v1618_v39 }
 0x1d5   : > { %v1040_v0 = vadd.f32 %v1008_v57, %v972_v31  ;;  %v1213_v14 = vmul.f32 %v3864_v58, %v3535_v22  ;;  %v1041_v47 = vadd.f32 %v1009_v40, %v973_v25  ;;  %v1248_v37 = vmul.f32 %v2727_v2, %v3585_v35  ;;  %v3661_v22 = vld [vmem:[#allocation2 + $0x16a] sm:$0xff] }
 0x1d6   : > { %2380 = vmatprep.mubr.bf16.mxu1 %v1874_v56  ;;  %v1249_v28 = vmul.f32 %v2727_v2, %v3587_v55  ;;  %v1316_v36 = vmul.f32 %v2744_v16, %v3640_v10  ;;  %v1658_v5 = vmul.f32 %v3468_v6, %v1619_v32  ;;  %v1696_v12 = vadd.f32 %v3487_v50, %v1657_v43  ;;  %v3679_v56 = vld [vmem:[#allocation2 + $0x180] sm:$0xff] }
 0x1d7   : > { %v1108_v63 = vadd.f32 %v1076_v9, %v1040_v0  ;;  %v1317_v20 = vmul.f32 %v2744_v16, %v3644_v61  ;;  %v1109_v27 = vadd.f32 %v1077_v53, %v1041_v47  ;;  %v1280_v7 = vadd.f32 %v1248_v37, %v1212_v29  ;;  %v3681_v53 = vld [vmem:[#allocation2 + $0x188] sm:$0xff] }
 0x1d8   : > { %v1281_v15 = vadd.f32 %v1249_v28, %v1213_v14  ;;  %v1452_v19 = vmul.f32 %v3867_v11, %v3561_v3  ;;  %v1697_v26 = vadd.f32 %v3487_v50, %v1658_v5  ;;  %v1760_v4 = vmul.f32 0.70710677, %v1696_v12 }
 0x1d9   : > { %v1453_v48 = vmul.f32 %v3867_v11, %v3564_v44  ;;  %v1488_v45 = vmul.f32 %v2746_v17, %v3606_v18  ;;  %v1348_v21 = vadd.f32 %v1316_v36, %v1280_v7  ;;  %v1489_v1 = vmul.f32 %v2746_v17, %v3617_v34 }
 0x1da   : > { %v2542_v46 = vpop.eup %2541  ;;  %v1349_v38 = vadd.f32 %v1317_v20, %v1281_v15  ;;  %v1556_v3 = vmul.f32 %v2754_v24, %v3661_v22  ;;  %v1727_v60 = vmul.f32 0.5, %v3613_v62  ;;  %v1761_v31 = vmul.f32 0.70710677, %v1697_v26 }
 0x1db   : > { %v2544_v41 = vpop.eup %2543  ;;  %v1822_v13 = vadd.f32 1.0, %v2542_v46  ;;  %2545 = verf.f32 %v1760_v4  ;;  %v1728_v25 = vmul.f32 0.5, %v1696_v12  ;;  %v1380_v57 = vadd.f32 %v1348_v21, %v1108_v63  ;;  %v3695_v12 = vld [vmem:[#allocation2 + $0x181] sm:$0xff] }
 0x1dc   : > { %v1823_v44 = vadd.f32 1.0, %v2544_v41  ;;  %v1520_v30 = vadd.f32 %v1488_v45, %v1452_v19  ;;  %2547 = verf.f32 %v1761_v31  ;;  %v1381_v39 = vadd.f32 %v1349_v38, %v1109_v27 }
 0x1dd   : > { %v1521_v40 = vadd.f32 %v1489_v1, %v1453_v48  ;;  %v1557_v9 = vmul.f32 %v2754_v24, %v3670_v23  ;;  %v1854_v29 = vmul.f32 %v1822_v13, %v1726_v49  ;;  %v974_v43 = vmul.f32 %v2710_v51, %v3569_v33 }
 0x1de   : > { %v1855_v32 = vmul.f32 %v1823_v44, %v1727_v60  ;;  %v1588_v62 = vadd.f32 %v1556_v3, %v1520_v30  ;;  %v975_v14 = vmul.f32 %v2710_v51, %v3581_v54  ;;  %v1010_v47 = vmul.f32 %v2718_v59, %v3624_v42  ;;  %v1179_v54 = vld [vmem:[#allocation2 + $0x189] sm:$0xff] }
 0x1df   : > { %v1589_v0 = vadd.f32 %v1557_v9, %v1521_v40  ;;  %v1011_v37 = vmul.f32 %v2718_v59, %v3628_v52  ;;  %v1078_v49 = vmul.f32 %v2735_v8, %v3679_v56  ;;  %v1079_v5 = vmul.f32 %v2735_v8, %v3681_v53  ;;  %v1418_v40 = vld [vmem:[#allocation2 + $0x182] sm:$0xff] }
 0x1e0   : > { %v1875_v28 = vpack.c.bf16 %v1855_v32, %v1854_v29  ;;  %v1620_v36 = vadd.f32 %v1588_v62, %v1380_v57  ;;  %v1042_v63 = vadd.f32 %v1010_v47, %v974_v43  ;;  %v1214_v27 = vmul.f32 %v3864_v58, %v3585_v35  ;;  %v1419_v62 = vld [vmem:[#allocation2 + $0x18a] sm:$0xff] }
 0x1e1   : > { %v1621_v33 = vadd.f32 %v1589_v0, %v1381_v39  ;;  %v1043_v20 = vadd.f32 %v1011_v37, %v975_v14  ;;  %v1215_v15 = vmul.f32 %v3864_v58, %v3587_v55  ;;  %v1250_v19 = vmul.f32 %v2727_v2, %v3640_v10  ;;  %v940_v37 = vld [vmem:[#allocation2 + $0x198] sm:$0xff] }
 0x1e2   : > { %2381 = vmatmul.mubr.bf16.gmra.mrb[20].mxu1 %v1875_v28  ;;  %v1659_v7 = vmul.f32 %v3468_v6, %v1620_v36  ;;  %v1251_v4 = vmul.f32 %v2727_v2, %v3644_v61  ;;  %v1110_v45 = vadd.f32 %v1078_v49, %v1042_v63  ;;  %v1318_v21 = vmul.f32 %v2744_v16, %v3695_v12 }
 0x1e3   : > { %v1660_v48 = vmul.f32 %v3468_v6, %v1621_v33  ;;  %v1111_v46 = vadd.f32 %v1079_v5, %v1043_v20  ;;  %v1282_v38 = vadd.f32 %v1250_v19, %v1214_v27  ;;  %v1319_v55 = vmul.f32 %v2744_v16, %v1179_v54 }
 0x1e4   : > { %v3710_v35 = vadd.f32 %v3487_v50, %v1659_v7  ;;  %v1283_v1 = vadd.f32 %v1251_v4, %v1215_v15  ;;  %v1454_v60 = vmul.f32 %v3867_v11, %v3606_v18  ;;  %v1490_v13 = vmul.f32 %v2746_v17, %v3661_v22  ;;  %v1180_v7 = vld [vmem:[#allocation2 + $0x199] sm:$0xff]  ;;  %v2563_v4 = vld [vmem:[#allocation2 + $0x8] sm:$0xff] }
 0x1e5   : > { %v2546_v3 = vpop.eup %2545  ;;  %v3714_v41 = vadd.f32 %v3487_v50, %v1660_v48  ;;  %v1491_v31 = vmul.f32 %v2746_v17, %v3670_v23  ;;  %v1729_v44 = vmul.f32 0.5, %v1697_v26  ;;  %v1350_v39 = vadd.f32 %v1318_v21, %v1282_v38 }
 0x1e6   : > { %v1824_v57 = vadd.f32 1.0, %v2546_v3  ;;  %v1762_v30 = vmul.f32 0.70710677, %v3710_v35  ;;  %v2548_v9 = vpop.eup %2547  ;;  %v1351_v32 = vadd.f32 %v1319_v55, %v1283_v1  ;;  %v1455_v18 = vmul.f32 %v3867_v11, %v3617_v34  ;;  %v1420_v3 = vld [vmem:[#allocation2 + $0x19a] sm:$0xff] }
 0x1e7   : > { %v1763_v29 = vmul.f32 0.70710677, %v3714_v41  ;;  %v1522_v43 = vadd.f32 %v1490_v13, %v1454_v60  ;;  %v1825_v0 = vadd.f32 1.0, %v2548_v9  ;;  %v1382_v47 = vadd.f32 %v1350_v39, %v1110_v45  ;;  %v1181_v45 = vld [vmem:[#allocation2 + $0x1a1] sm:$0xff] }
 0x1e8   : > { %v1856_v14 = vmul.f32 %v1824_v57, %v1728_v25  ;;  %2549 = verf.f32 %v1762_v30  ;;  %v1383_v26 = vadd.f32 %v1351_v32, %v1111_v46  ;;  %v1523_v28 = vadd.f32 %v1491_v31, %v1455_v18  ;;  %v1421_v18 = vld [vmem:[#allocation2 + $0x1a2] sm:$0xff] }
 0x1e9   : > { %2551 = verf.f32 %v1763_v29  ;;  %v1558_v36 = vmul.f32 %v2754_v24, %v1418_v40  ;;  %v1857_v49 = vmul.f32 %v1825_v0, %v1729_v44  ;;  %v1559_v5 = vmul.f32 %v2754_v24, %v1419_v62 }
 0x1ea   : > { %v976_v33 = vmul.f32 %v2710_v51, %v3624_v42  ;;  %v977_v34 = vmul.f32 %v2710_v51, %v3628_v52  ;;  %v1012_v25 = vmul.f32 %v2718_v59, %v3679_v56  ;;  %v1013_v20 = vmul.f32 %v2718_v59, %v3681_v53 }
 0x1eb   : > { %v1590_v63 = vadd.f32 %v1558_v36, %v1522_v43  ;;  %v1080_v27 = vmul.f32 %v2735_v8, %v940_v37  ;;  %v1876_v15 = vpack.c.bf16 %v1857_v49, %v1856_v14  ;;  %v1591_v19 = vadd.f32 %v1559_v5, %v1523_v28 }
 0x1ec   : > { %v1081_v48 = vmul.f32 %v2563_v4, %v2735_v8  ;;  %v1216_v42 = vmul.f32 %v3864_v58, %v3640_v10  ;;  %v1044_v52 = vadd.f32 %v1012_v25, %v976_v33  ;;  %v1045_v46 = vadd.f32 %v1013_v20, %v977_v34 }
 0x1ed   : > { %v1622_v51 = vadd.f32 %v1590_v63, %v1382_v47  ;;  %v1217_v56 = vmul.f32 %v3864_v58, %v3644_v61  ;;  %2384 = vmatprep.mubr.bf16.mxu1 %v1876_v15  ;;  %v1623_v59 = vadd.f32 %v1591_v19, %v1383_v26  ;;  %v1252_v53 = vmul.f32 %v2727_v2, %v3695_v12 }
 0x1ee   : > { %v1253_v21 = vmul.f32 %v2727_v2, %v1179_v54  ;;  %v1320_v38 = vmul.f32 %v2744_v16, %v1180_v7  ;;  %v1112_v1 = vadd.f32 %v1080_v27, %v1044_v52  ;;  %v1113_v55 = vadd.f32 %v1081_v48, %v1045_v46 }
 0x1ef   : > { %v1661_v8 = vmul.f32 %v3468_v6, %v1622_v51  ;;  %v1321_v10 = vmul.f32 %v2744_v16, %v1181_v45  ;;  %v1662_v60 = vmul.f32 %v3468_v6, %v1623_v59  ;;  %v1284_v13 = vadd.f32 %v1252_v53, %v1216_v42 }
 0x1f0   : > { %v1285_v58 = vadd.f32 %v1253_v21, %v1217_v56  ;;  %v1456_v61 = vmul.f32 %v3867_v11, %v3661_v22  ;;  %v1457_v2 = vmul.f32 %v3867_v11, %v3670_v23  ;;  %v1492_v54 = vmul.f32 %v2746_v17, %v1418_v40  ;;  %v3769_v21 = vld [vmem:[%s3850_s7] ss:$0 sm:$0xff] }
 0x1f1   : > { %v1700_v12 = vadd.f32 %v3487_v50, %v1661_v8  ;;  %v1493_v31 = vmul.f32 %v2746_v17, %v1419_v62  ;;  %v1701_v16 = vadd.f32 %v3487_v50, %v1662_v60  ;;  %v1352_v57 = vadd.f32 %v1320_v38, %v1284_v13 }
 0x1f2   : > { %v2550_v44 = vpop.eup %2549  ;;  %v1353_v30 = vadd.f32 %v1321_v10, %v1285_v58  ;;  %v1560_v39 = vmul.f32 %v2754_v24, %v1420_v3  ;;  %v1730_v29 = vmul.f32 0.5, %v3710_v35  ;;  %v1524_v43 = vadd.f32 %v1492_v54, %v1456_v61 }
 0x1f3   : > { %v2552_v9 = vpop.eup %2551  ;;  %v1826_v22 = vadd.f32 1.0, %v2550_v44  ;;  %v1764_v32 = vmul.f32 0.70710677, %v1700_v12  ;;  %v1731_v11 = vmul.f32 0.5, %v3714_v41  ;;  %v1765_v40 = vmul.f32 0.70710677, %v1701_v16 }
 0x1f4   : > { %v1827_v23 = vadd.f32 1.0, %v2552_v9  ;;  %v1384_v0 = vadd.f32 %v1352_v57, %v1112_v1  ;;  %v1385_v62 = vadd.f32 %v1353_v30, %v1113_v55  ;;  %v1525_v14 = vadd.f32 %v1493_v31, %v1457_v2 }
 0x1f5   : > { %v1858_v17 = vmul.f32 %v1826_v22, %v1730_v29  ;;  %2553 = verf.f32 %v1764_v32  ;;  %v1561_v37 = vmul.f32 %v2754_v24, %v1421_v18  ;;  %v1592_v26 = vadd.f32 %v1560_v39, %v1524_v43 }
 0x1f6   : > { %v1859_v47 = vmul.f32 %v1827_v23, %v1731_v11  ;;  %2555 = verf.f32 %v1765_v40  ;;  %v1732_v24 = vmul.f32 0.5, %v1700_v12  ;;  %v1733_v15 = vmul.f32 0.5, %v1701_v16 }
 0x1f7   : > { %v1593_v35 = vadd.f32 %v1561_v37, %v1525_v14  ;;  %v1624_v36 = vadd.f32 %v1592_v26, %v1384_v0 }
 0x1f8   : > { %v1877_v28 = vpack.c.bf16 %v1859_v47, %v1858_v17 }
 0x1f9   : > { %v1625_v49 = vadd.f32 %v1593_v35, %v1385_v62  ;;  %v1663_v5 = vmul.f32 %v3468_v6, %v1624_v36 }
 0x1fa   : > { %2385 = vmatmul.mubr.bf16.gmra.mrb[24].mxu1 %v1877_v28 }
 0x1fb   : > { %v1664_v41 = vmul.f32 %v3468_v6, %v1625_v49  ;;  %v1702_v33 = vadd.f32 %v3487_v50, %v1663_v5 }
 0x1fd   : > { %v1703_v34 = vadd.f32 %v3487_v50, %v1664_v41  ;;  %v1766_v63 = vmul.f32 0.70710677, %v1702_v33  ;;  %v1734_v52 = vmul.f32 0.5, %v1702_v33 }
 0x1ff   : > { %v2554_v25 = vpop.eup %2553  ;;  %v1767_v7 = vmul.f32 0.70710677, %v1703_v34  ;;  %2557 = verf.f32 %v1766_v63  ;;  %v1735_v50 = vmul.f32 0.5, %v1703_v34 }
 0x200   : > { %v2556_v20 = vpop.eup %2555  ;;  %v1828_v27 = vadd.f32 1.0, %v2554_v25 }
 0x201   : > { %v1829_v19 = vadd.f32 1.0, %v2556_v20  ;;  %2559 = verf.f32 %v1767_v7 }
 0x202   : > { %v1860_v4 = vmul.f32 %v1828_v27, %v1732_v24 }
 0x203   : > { %v1861_v48 = vmul.f32 %v1829_v19, %v1733_v15 }
 0x205   : > { %v1878_v45 = vpack.c.bf16 %v1861_v48, %v1860_v4 }
 0x207   : > { %2388 = vmatprep.mubr.bf16.mxu1 %v1878_v45 }
 0x209   : > { %v2558_v6 = vpop.eup %2557 }
 0x20a   : > { %v1830_v42 = vadd.f32 1.0, %v2558_v6 }
 0x20b   : > { %v2560_v51 = vpop.eup %2559 }
 0x20c   : > { %v1831_v46 = vadd.f32 1.0, %v2560_v51  ;;  %v1862_v56 = vmul.f32 %v1830_v42, %v1734_v52 }
 0x20e   : > { %v1863_v59 = vmul.f32 %v1831_v46, %v1735_v50 }
 0x210   : > { %v1879_v53 = vpack.c.bf16 %v1863_v59, %v1862_v56 }
 0x212   : > { %2389 = vmatmul.mubr.bf16.gmra.mrb[28].mxu1 %v1879_v53 }
 0x23b   : > { %v2362_v38 = vpop.f32.mrb[0].mxu1 }
 0x23c   : > { %v1994_v8 = vadd.f32 %v2362_v38, %v3769_v21  ;;  %v1985_v1 = vpop.f32.mrb[1].mxu1 }
 0x23d   : > { %v1986_v55 = vadd.f32 %v3769_v21, %v1985_v1  ;;  %v2363_v10 = vpop.f32.mrb[2].mxu1 }
 0x23e   : > { %2114 = vst [vmem:[%s3774_s24 + $0x10] sm:$0xff] %v1994_v8  ;;  %v1997_v3 = vadd.f32 %v2363_v10, %v3769_v21  ;;  %v1988_v60 = vpop.f32.mrb[3].mxu1 }
 0x23f   : > { %2112 = vst [vmem:[%s3774_s24] sm:$0xff] %v1986_v55  ;;  %v1989_v13 = vadd.f32 %v3769_v21, %v1988_v60 }
 0x240   : > { %2115 = vst [vmem:[%s3774_s24 + $0x18] sm:$0xff] %v1997_v3 }
 0x241   : > { %2113 = vst [vmem:[%s3774_s24 + $0x8] sm:$0xff] %v1989_v13 }
 0x253   : > { %v2366_v58 = vpop.f32.mrb[4].mxu1 }
 0x254   : > { %v2010_v61 = vadd.f32 %v2366_v58, %v3769_v21  ;;  %v2001_v12 = vpop.f32.mrb[5].mxu1 }
 0x255   : > { %v2002_v2 = vadd.f32 %v3769_v21, %v2001_v12  ;;  %v2367_v54 = vpop.f32.mrb[6].mxu1 }
 0x256   : > { %2118 = vst [vmem:[%s3774_s24 + $0x30] sm:$0xff] %v2010_v61  ;;  %v2013_v31 = vadd.f32 %v2367_v54, %v3769_v21  ;;  %v2004_v44 = vpop.f32.mrb[7].mxu1 }
 0x257   : > { %2116 = vst [vmem:[%s3774_s24 + $0x20] sm:$0xff] %v2002_v2  ;;  %v2005_v16 = vadd.f32 %v3769_v21, %v2004_v44 }
 0x258   : > { %2119 = vst [vmem:[%s3774_s24 + $0x38] sm:$0xff] %v2013_v31 }
 0x259   : > { %2117 = vst [vmem:[%s3774_s24 + $0x28] sm:$0xff] %v2005_v16 }
 0x26a   : > { %v2370_v57 = vpop.f32.mrb[8].mxu1 }
 0x26b   : > { %v2026_v30 = vadd.f32 %v2370_v57, %v3769_v21  ;;  %v2017_v39 = vpop.f32.mrb[9].mxu1 }
 0x26c   : > { %v2018_v9 = vadd.f32 %v3769_v21, %v2017_v39  ;;  %v2371_v29 = vpop.f32.mrb[10].mxu1 }
 0x26d   : > { %2122 = vst [vmem:[%s3774_s24 + $0x50] sm:$0xff] %v2026_v30  ;;  %v2029_v22 = vadd.f32 %v2371_v29, %v3769_v21  ;;  %v2020_v32 = vpop.f32.mrb[11].mxu1 }
 0x26e   : > { %2120 = vst [vmem:[%s3774_s24 + $0x40] sm:$0xff] %v2018_v9  ;;  %v2021_v18 = vadd.f32 %v3769_v21, %v2020_v32 }
 0x26f   : > { %2123 = vst [vmem:[%s3774_s24 + $0x58] sm:$0xff] %v2029_v22 }
 0x270   : > { %2121 = vst [vmem:[%s3774_s24 + $0x48] sm:$0xff] %v2021_v18 }
 0x285   : > { %v2374_v43 = vpop.f32.mrb[12].mxu1 }
 0x286   : > { %v2042_v11 = vadd.f32 %v2374_v43, %v3769_v21  ;;  %v2033_v23 = vpop.f32.mrb[13].mxu1 }
 0x287   : > { %v2034_v40 = vadd.f32 %v3769_v21, %v2033_v23  ;;  %v2375_v0 = vpop.f32.mrb[14].mxu1 }
 0x288   : > { %2126 = vst [vmem:[%s3774_s24 + $0x70] sm:$0xff] %v2042_v11  ;;  %v2045_v17 = vadd.f32 %v2375_v0, %v3769_v21  ;;  %v2036_v62 = vpop.f32.mrb[15].mxu1 }
 0x289   : > { %2124 = vst [vmem:[%s3774_s24 + $0x60] sm:$0xff] %v2034_v40  ;;  %v2037_v14 = vadd.f32 %v3769_v21, %v2036_v62 }
 0x28a   : > { %2127 = vst [vmem:[%s3774_s24 + $0x78] sm:$0xff] %v2045_v17 }
 0x28b   : > { %2125 = vst [vmem:[%s3774_s24 + $0x68] sm:$0xff] %v2037_v14 }
 0x29c   : > { %v2378_v47 = vpop.f32.mrb[16].mxu1 }
 0x29d   : > { %v2058_v37 = vadd.f32 %v2378_v47, %v3769_v21  ;;  %v2049_v26 = vpop.f32.mrb[17].mxu1 }
 0x29e   : > { %v2050_v28 = vadd.f32 %v3769_v21, %v2049_v26  ;;  %v2379_v35 = vpop.f32.mrb[18].mxu1 }
 0x29f   : > { %2130 = vst [vmem:[%s3774_s24 + $0x90] sm:$0xff] %v2058_v37  ;;  %v2061_v36 = vadd.f32 %v2379_v35, %v3769_v21  ;;  %v2052_v49 = vpop.f32.mrb[19].mxu1 }
 0x2a0   : > { %2128 = vst [vmem:[%s3774_s24 + $0x80] sm:$0xff] %v2050_v28  ;;  %v2053_v5 = vadd.f32 %v3769_v21, %v2052_v49 }
 0x2a1   : > { %2131 = vst [vmem:[%s3774_s24 + $0x98] sm:$0xff] %v2061_v36 }
 0x2a2   : > { %2129 = vst [vmem:[%s3774_s24 + $0x88] sm:$0xff] %v2053_v5 }
 0x2b5   : > { %v2382_v41 = vpop.f32.mrb[20].mxu1 }
 0x2b6   : > { %v2074_v33 = vadd.f32 %v2382_v41, %v3769_v21  ;;  %v2065_v34 = vpop.f32.mrb[21].mxu1 }
 0x2b7   : > { %v2066_v63 = vadd.f32 %v3769_v21, %v2065_v34  ;;  %v2383_v25 = vpop.f32.mrb[22].mxu1 }
 0x2b8   : > { %2134 = vst [vmem:[%s3774_s24 + $0xb0] sm:$0xff] %v2074_v33  ;;  %v2077_v20 = vadd.f32 %v2383_v25, %v3769_v21  ;;  %v2068_v27 = vpop.f32.mrb[23].mxu1 }
 0x2b9   : > { %2132 = vst [vmem:[%s3774_s24 + $0xa0] sm:$0xff] %v2066_v63  ;;  %v2069_v7 = vadd.f32 %v3769_v21, %v2068_v27 }
 0x2ba   : > { %2135 = vst [vmem:[%s3774_s24 + $0xb8] sm:$0xff] %v2077_v20 }
 0x2bb   : > { %2133 = vst [vmem:[%s3774_s24 + $0xa8] sm:$0xff] %v2069_v7 }
 0x2cd   : > { %v2386_v24 = vpop.f32.mrb[24].mxu1 }
 0x2ce   : > { %v2090_v15 = vadd.f32 %v2386_v24, %v3769_v21  ;;  %v2081_v19 = vpop.f32.mrb[25].mxu1 }
 0x2cf   : > { %v2082_v4 = vadd.f32 %v3769_v21, %v2081_v19  ;;  %v2387_v48 = vpop.f32.mrb[26].mxu1 }
 0x2d0   : > { %2138 = vst [vmem:[%s3774_s24 + $0xd0] sm:$0xff] %v2090_v15  ;;  %v2093_v45 = vadd.f32 %v2387_v48, %v3769_v21  ;;  %v2084_v6 = vpop.f32.mrb[27].mxu1 }
 0x2d1   : > { %2136 = vst [vmem:[%s3774_s24 + $0xc0] sm:$0xff] %v2082_v4  ;;  %v2085_v42 = vadd.f32 %v3769_v21, %v2084_v6 }
 0x2d2   : > { %2139 = vst [vmem:[%s3774_s24 + $0xd8] sm:$0xff] %v2093_v45 }
 0x2d3   : > { %2137 = vst [vmem:[%s3774_s24 + $0xc8] sm:$0xff] %v2085_v42 }
 0x2e5   : > { %v2390_v51 = vpop.f32.mrb[28].mxu1 }
 0x2e6   : > { %v2106_v52 = vadd.f32 %v2390_v51, %v3769_v21  ;;  %v2097_v50 = vpop.f32.mrb[29].mxu1 }
 0x2e7   : > { %v2098_v46 = vadd.f32 %v3769_v21, %v2097_v50  ;;  %v2391_v56 = vpop.f32.mrb[30].mxu1 }
 0x2e8   : > { %2142 = vst [vmem:[%s3774_s24 + $0xf0] sm:$0xff] %v2106_v52  ;;  %v2109_v59 = vadd.f32 %v2391_v56, %v3769_v21  ;;  %v2100_v53 = vpop.f32.mrb[31].mxu1 }
 0x2e9   : > { %2140 = vst [vmem:[%s3774_s24 + $0xe0] sm:$0xff] %v2098_v46  ;;  %v2101_v38 = vadd.f32 %v3769_v21, %v2100_v53 }
 0x2ea   : > { %2143 = vst [vmem:[%s3774_s24 + $0xf8] sm:$0xff] %v2109_v59 }
 0x2eb   : > { %2141 = vst [vmem:[%s3774_s24 + $0xe8] sm:$0xff] %v2101_v38 }
 0x2ec PF: > { %s18_s27 = sadd.s32 1, %s2570_s27  }
 0x2ed   : > { %p15_p4 = scmp.ge.s32.totalorder %s18_s27, 4  }
 0x2ef   :  { %17 = sbr.rel (!%p15_p4) target bundleno = 1 (0x1), region = 84 }

</bundles_post_ra>
